<compile_context>
chip_gen: v7x
topology: tpu7x:2x2x1
jax: 0.10.0
libtpu: 0.0.40
codegen_flags: <defaults>
</compile_context>

<pallas_src>
import functools

import jax
import jax.numpy as jnp
from jax import lax
from jax.experimental import pallas as pl
from jax.experimental.pallas import tpu as pltpu


# NT matmul dimension numbers: contract the minor (lane) dim of both operands
# (same pattern as the flash/splash-attention q @ k^T dot).
_NT_DIMS = (((1,), (1,)), ((), ()))


def _mlp_kernel(x_ref,
                w1_ref, b1_ref,
                w2_ref, b2_ref,
                w3_ref, b3_ref,
                w4_ref, b4_ref,
                w5r_ref, b5_ref,
                o_ref):
    # In-kernel f32 -> bf16 cast of the activations (VPU work hidden under the
    # MXU) so the wrapper never makes a separate HBM cast pass over x.
    x = x_ref[...].astype(jnp.bfloat16)                       # (tile_b, D)

    # fc1 -> ReLU   (dropout = identity in eval mode)
    h = jnp.dot(x, w1_ref[...], preferred_element_type=jnp.float32) + b1_ref[...]
    h = jnp.maximum(h, 0.0)

    # fc2 -> ReLU
    h = jnp.dot(h.astype(jnp.bfloat16), w2_ref[...],
                preferred_element_type=jnp.float32) + b2_ref[...]
    h = jnp.maximum(h, 0.0)

    # fc3 -> ReLU
    h = jnp.dot(h.astype(jnp.bfloat16), w3_ref[...],
                preferred_element_type=jnp.float32) + b3_ref[...]
    h = jnp.maximum(h, 0.0)

    # fc4 -> ReLU.  w4/b4 are zero-padded from 32 -> 128 output features in
    # prepare_params (free: N<=128 pads to a full MXU pass anyway), so h is
    # (tile_b, 128) f32 with columns 32.. equal to relu(0) = 0.
    h = jnp.dot(h.astype(jnp.bfloat16), w4_ref[...],
                preferred_element_type=jnp.float32) + b4_ref[...]
    h = jnp.maximum(h, 0.0)                                   # (tile_b, 128)

    # fc5 as a single NT matmul that puts the batch dim in LANES:
    #   (8, 128) @ (tile_b, 128)^T -> (8, tile_b), all 8 rows identical
    # (w5 replicated, zero-padded over the fake feature columns).  The final
    # store is therefore lane-dense (full 128-lane vst) and the output VMEM
    # window is (8, tile_b) instead of a lane-padded (tile_b, 128).
    s = lax.dot_general(w5r_ref[...], h, _NT_DIMS,
                        preferred_element_type=jnp.float32)
    logits = s[0:1, :] + b5_ref[...]                          # (1, tile_b)

    # Exact sigmoid (EUP exp + exact divide); saturates correctly for large |logits|.
    o_ref[...] = 1.0 / (1.0 + jnp.exp(-logits))


def _round_up(n, m):
    return ((n + m - 1) // m) * m


def _choose_tiling(batch, cap):
    """Pick (tile_b, num_tiles, padded_batch).

    * small-batch clamp: tile_b = round_up(B, 512) so tiny requests don't run
      a full cap-row tile of padded compute,
    * large batches: at least 2 tiles so v7x's two TensorCores (which split
      the "parallel" grid axis) both get work; v5e/v6e are unaffected.
    """
    tile_b = min(cap, _round_up(max(batch, 1), 512))
    num_tiles = pl.cdiv(batch, tile_b)
    if num_tiles == 1 and tile_b >= 1024:
        tile_b = _round_up(pl.cdiv(batch, 2), 512)
        num_tiles = pl.cdiv(batch, tile_b)
    return tile_b, num_tiles, num_tiles * tile_b


def prepare_params(params):
    """One-time conversion of f32 PyTorch-layout params ((in,out) weights,
    (1,out) biases) into kernel-ready arrays: bf16 MXU weights, f32 biases,
    with fc4/fc5 zero-padded to a 128-wide feature block and w5 replicated to
    8 rows so fc5 is one lane-dense NT matmul.  Call once, not per forward."""
    w4p = jnp.zeros((64, 128), jnp.float32).at[:, :32].set(params["w4"])
    b4p = jnp.zeros((1, 128), jnp.float32).at[:, :32].set(params["b4"])
    w5r = jnp.zeros((8, 128), jnp.float32).at[:, :32].set(
        jnp.broadcast_to(params["w5"].reshape(1, 32), (8, 32)))
    return {
        "w1": params["w1"].astype(jnp.bfloat16),
        "b1": params["b1"].astype(jnp.float32),
        "w2": params["w2"].astype(jnp.bfloat16),
        "b2": params["b2"].astype(jnp.float32),
        "w3": params["w3"].astype(jnp.bfloat16),
        "b3": params["b3"].astype(jnp.float32),
        "w4": w4p.astype(jnp.bfloat16),
        "b4": b4p,
        "w5r": w5r,
        "b5": params["b5"].reshape(1, 1).astype(jnp.float32),
    }


@functools.partial(jax.jit, static_argnames=("tile_cap",))
def nba_rebound_forward(x, kparams, *, tile_cap=4096):
    """Forward pass of NBAReboundModel (eval mode) as one Pallas kernel.

    x: (B, input_dim) float32.   kparams: output of prepare_params().
    """
    batch, in_dim = x.shape
    tile_b, num_tiles, b_pad = _choose_tiling(batch, tile_cap)
    if b_pad != batch:
        x = jnp.pad(x, ((0, b_pad - batch), (0, 0)))

    def resident(a):
        # Full-array block, constant index_map: DMA'd once, VMEM-resident
        # across the whole grid while x tiles stream through the pipeline.
        return pl.BlockSpec(a.shape, lambda i: (0, 0))

    kp = kparams
    out = pl.pallas_call(
        _mlp_kernel,
        # Lane-dense output: one row of B_pad logits; tile i writes the
        # (1, tile_b) column slab [i*tile_b, (i+1)*tile_b).
        out_shape=jax.ShapeDtypeStruct((1, b_pad), jnp.float32),
        grid=(num_tiles,),
        in_specs=[
            pl.BlockSpec((tile_b, in_dim), lambda i: (i, 0)),   # x tile (f32)
            resident(kp["w1"]), resident(kp["b1"]),
            resident(kp["w2"]), resident(kp["b2"]),
            resident(kp["w3"]), resident(kp["b3"]),
            resident(kp["w4"]), resident(kp["b4"]),
            resident(kp["w5r"]), resident(kp["b5"]),
        ],
        out_specs=pl.BlockSpec((1, tile_b), lambda i: (0, i)),
        compiler_params=pltpu.CompilerParams(
            dimension_semantics=("parallel",),   # v7x: 2 TCs split the tiles
            # Explicit VMEM budget (review): at tile_b=4096 this needs
            # ~1 MB double-buffered x + ~80 KB resident weights + <=4 MB f32
            # intermediates + ~0.25 MB output windows -- far below 32 MiB,
            # which also fits v7x's 64 MiB physical / 32 MiB scoped VMEM.
            vmem_limit_bytes=32 * 1024 * 1024),
    )(x, kp["w1"], kp["b1"], kp["w2"], kp["b2"], kp["w3"], kp["b3"],
      kp["w4"], kp["b4"], kp["w5r"], kp["b5"])

    # (1, B_pad) -> (B_pad, 1) is a free row-major relabel; drop padded rows.
    return out.reshape(b_pad, 1)[:batch]


def init_params(key, input_dim):
    """Deterministic init matching PyTorch nn.Linear default:
    uniform(-1/sqrt(fan_in), 1/sqrt(fan_in)) for both weight and bias."""
    dims = [(input_dim, 128), (128, 64), (64, 64), (64, 32), (32, 1)]
    params = {}
    for i, (fan_in, fan_out) in enumerate(dims, start=1):
        key, kw, kb = jax.random.split(key, 3)
        bound = 1.0 / jnp.sqrt(jnp.float32(fan_in))
        params[f"w{i}"] = jax.random.uniform(
            kw, (fan_in, fan_out), jnp.float32, -bound, bound)
        params[f"b{i}"] = jax.random.uniform(
            kb, (1, fan_out), jnp.float32, -bound, bound)
    return params


def reference_forward_f32(x, params):
    """Pure-JAX f32 reference (exact PyTorch forward semantics, eval mode)."""
    h = jnp.maximum(x @ params["w1"] + params["b1"], 0.0)
    h = jnp.maximum(h @ params["w2"] + params["b2"], 0.0)
    h = jnp.maximum(h @ params["w3"] + params["b3"], 0.0)
    h = jnp.maximum(h @ params["w4"] + params["b4"], 0.0)
    return jax.nn.sigmoid(h @ params["w5"] + params["b5"])


def reference_forward_bf16(x, params):
    """Pure-JAX reference mirroring the kernel's bf16-operand / f32-accum math
    (fc1..fc4 bf16 on the MXU, fc5 in f32)."""
    def bdot(a, w):
        return jnp.dot(a.astype(jnp.bfloat16), w.astype(jnp.bfloat16),
                       preferred_element_type=jnp.float32)
    h = jnp.maximum(bdot(x, params["w1"]) + params["b1"], 0.0)
    h = jnp.maximum(bdot(h, params["w2"]) + params["b2"], 0.0)
    h = jnp.maximum(bdot(h, params["w3"]) + params["b3"], 0.0)
    h = jnp.maximum(bdot(h, params["w4"]) + params["b4"], 0.0)
    return jax.nn.sigmoid(h @ params["w5"] + params["b5"])


if __name__ == "__main__":
    key = jax.random.PRNGKey(0)
    key, kx, kx2 = jax.random.split(key, 3)

    input_dim = 32
    params = init_params(key, input_dim)
    kparams = prepare_params(params)   # one-time bf16/f32 conversion + padding

    # Small batch (clamped to a single 512-row tile inside the wrapper).
    batch = 8
    x = jax.random.normal(kx, (batch, input_dim), jnp.float32)
    out = jax.block_until_ready(nba_rebound_forward(x, kparams))
    assert out.shape == (batch, 1)
    ref_bf16 = reference_forward_bf16(x, params)
    ref_f32 = reference_forward_f32(x, params)
    assert jnp.allclose(out, ref_bf16, atol=5e-3, rtol=5e-3), "mismatch vs bf16 reference"
    assert jnp.allclose(out, ref_f32, atol=5e-2, rtol=5e-2), "mismatch vs f32 reference"

    # Larger batch exercising multiple grid tiles (1200 -> two 1024-row tiles,
    # so both the batch-parallel grid and the lane-dense output stitching run).
    batch2 = 1200
    x2 = jax.random.normal(kx2, (batch2, input_dim), jnp.float32)
    out2 = jax.block_until_ready(nba_rebound_forward(x2, kparams))
    assert out2.shape == (batch2, 1)
    ref2 = reference_forward_bf16(x2, params)
    assert jnp.allclose(out2, ref2, atol=5e-3, rtol=5e-3), "mismatch vs bf16 reference (tiled)"

    print("KERNEL_OK")
</pallas_src>

<mosaic_0001>
module attributes {stable_mosaic.version = 11 : i64} {
  func.func @_mlp_kernel(%arg0: i32, %arg1: memref<512x32xf32, #tpu.memory_space<vmem>>, %arg2: memref<32x128xbf16, #tpu.memory_space<vmem>>, %arg3: memref<1x128xf32, #tpu.memory_space<vmem>>, %arg4: memref<128x64xbf16, #tpu.memory_space<vmem>>, %arg5: memref<1x64xf32, #tpu.memory_space<vmem>>, %arg6: memref<64x64xbf16, #tpu.memory_space<vmem>>, %arg7: memref<1x64xf32, #tpu.memory_space<vmem>>, %arg8: memref<64x128xbf16, #tpu.memory_space<vmem>>, %arg9: memref<1x128xf32, #tpu.memory_space<vmem>>, %arg10: memref<8x128xf32, #tpu.memory_space<vmem>>, %arg11: memref<1x1xf32, #tpu.memory_space<vmem>>, %arg12: memref<1x512xf32, #tpu.memory_space<vmem>>) attributes {dimension_semantics = [#tpu.dimension_semantics<parallel>], iteration_bounds = array<i64: 1>, scalar_prefetch = 0 : i64, scratch_operands = 0 : i64, tpu.core_type = #tpu.core_type<tc>, window_params = [{transform_indices = @transform_0, window_bounds = array<i64: 512, 32>}, {pipeline_mode = #tpu.pipeline_mode<synchronous>, transform_indices = @transform_1, window_bounds = array<i64: 32, 128>}, {pipeline_mode = #tpu.pipeline_mode<synchronous>, transform_indices = @transform_2, window_bounds = array<i64: 1, 128>}, {pipeline_mode = #tpu.pipeline_mode<synchronous>, transform_indices = @transform_3, window_bounds = array<i64: 128, 64>}, {pipeline_mode = #tpu.pipeline_mode<synchronous>, transform_indices = @transform_4, window_bounds = array<i64: 1, 64>}, {pipeline_mode = #tpu.pipeline_mode<synchronous>, transform_indices = @transform_5, window_bounds = array<i64: 64, 64>}, {pipeline_mode = #tpu.pipeline_mode<synchronous>, transform_indices = @transform_6, window_bounds = array<i64: 1, 64>}, {pipeline_mode = #tpu.pipeline_mode<synchronous>, transform_indices = @transform_7, window_bounds = array<i64: 64, 128>}, {pipeline_mode = #tpu.pipeline_mode<synchronous>, transform_indices = @transform_8, window_bounds = array<i64: 1, 128>}, {pipeline_mode = #tpu.pipeline_mode<synchronous>, transform_indices = @transform_9, window_bounds = array<i64: 8, 128>}, {pipeline_mode = #tpu.pipeline_mode<synchronous>, transform_indices = @transform_10, window_bounds = array<i64: 1, 1>}, {transform_indices = @transform_11, window_bounds = array<i64: 1, 512>}]} {
    %c0 = arith.constant 0 : index
    %c0_0 = arith.constant 0 : index
    %0 = vector.load %arg1[%c0, %c0_0] : memref<512x32xf32, #tpu.memory_space<vmem>>, vector<512x32xf32>
    %1 = arith.truncf %0 : vector<512x32xf32> to vector<512x32xbf16>
    %c0_1 = arith.constant 0 : index
    %c0_2 = arith.constant 0 : index
    %2 = vector.load %arg2[%c0_1, %c0_2] : memref<32x128xbf16, #tpu.memory_space<vmem>>, vector<32x128xbf16>
    %cst = arith.constant dense<0.000000e+00> : vector<512x128xf32>
    %3 = tpu.matmul %1, %2, %cst {dimension_numbers = #tpu.dot_dimension_numbers<[1], [0], [0], [1], [0, 0, 1, 1], [], []>} : vector<512x32xbf16>, vector<32x128xbf16>, vector<512x128xf32> -> vector<512x128xf32>
    %c0_3 = arith.constant 0 : index
    %c0_4 = arith.constant 0 : index
    %4 = vector.load %arg3[%c0_3, %c0_4] : memref<1x128xf32, #tpu.memory_space<vmem>>, vector<1x128xf32>
    %5 = vector.broadcast %4 : vector<1x128xf32> to vector<512x128xf32>
    %6 = arith.addf %3, %5 : vector<512x128xf32>
    %cst_5 = arith.constant 0.000000e+00 : f32
    %7 = vector.broadcast %cst_5 : f32 to vector<512x128xf32>
    %8 = arith.maximumf %6, %7 : vector<512x128xf32>
    %9 = arith.truncf %8 : vector<512x128xf32> to vector<512x128xbf16>
    %c0_6 = arith.constant 0 : index
    %c0_7 = arith.constant 0 : index
    %10 = vector.load %arg4[%c0_6, %c0_7] : memref<128x64xbf16, #tpu.memory_space<vmem>>, vector<128x64xbf16>
    %cst_8 = arith.constant dense<0.000000e+00> : vector<512x64xf32>
    %11 = tpu.matmul %9, %10, %cst_8 {dimension_numbers = #tpu.dot_dimension_numbers<[1], [0], [0], [1], [0, 0, 1, 1], [], []>} : vector<512x128xbf16>, vector<128x64xbf16>, vector<512x64xf32> -> vector<512x64xf32>
    %c0_9 = arith.constant 0 : index
    %c0_10 = arith.constant 0 : index
    %12 = vector.load %arg5[%c0_9, %c0_10] : memref<1x64xf32, #tpu.memory_space<vmem>>, vector<1x64xf32>
    %13 = vector.broadcast %12 : vector<1x64xf32> to vector<512x64xf32>
    %14 = arith.addf %11, %13 : vector<512x64xf32>
    %cst_11 = arith.constant 0.000000e+00 : f32
    %15 = vector.broadcast %cst_11 : f32 to vector<512x64xf32>
    %16 = arith.maximumf %14, %15 : vector<512x64xf32>
    %17 = arith.truncf %16 : vector<512x64xf32> to vector<512x64xbf16>
    %c0_12 = arith.constant 0 : index
    %c0_13 = arith.constant 0 : index
    %18 = vector.load %arg6[%c0_12, %c0_13] : memref<64x64xbf16, #tpu.memory_space<vmem>>, vector<64x64xbf16>
    %cst_14 = arith.constant dense<0.000000e+00> : vector<512x64xf32>
    %19 = tpu.matmul %17, %18, %cst_14 {dimension_numbers = #tpu.dot_dimension_numbers<[1], [0], [0], [1], [0, 0, 1, 1], [], []>} : vector<512x64xbf16>, vector<64x64xbf16>, vector<512x64xf32> -> vector<512x64xf32>
    %c0_15 = arith.constant 0 : index
    %c0_16 = arith.constant 0 : index
    %20 = vector.load %arg7[%c0_15, %c0_16] : memref<1x64xf32, #tpu.memory_space<vmem>>, vector<1x64xf32>
    %21 = vector.broadcast %20 : vector<1x64xf32> to vector<512x64xf32>
    %22 = arith.addf %19, %21 : vector<512x64xf32>
    %cst_17 = arith.constant 0.000000e+00 : f32
    %23 = vector.broadcast %cst_17 : f32 to vector<512x64xf32>
    %24 = arith.maximumf %22, %23 : vector<512x64xf32>
    %25 = arith.truncf %24 : vector<512x64xf32> to vector<512x64xbf16>
    %c0_18 = arith.constant 0 : index
    %c0_19 = arith.constant 0 : index
    %26 = vector.load %arg8[%c0_18, %c0_19] : memref<64x128xbf16, #tpu.memory_space<vmem>>, vector<64x128xbf16>
    %cst_20 = arith.constant dense<0.000000e+00> : vector<512x128xf32>
    %27 = tpu.matmul %25, %26, %cst_20 {dimension_numbers = #tpu.dot_dimension_numbers<[1], [0], [0], [1], [0, 0, 1, 1], [], []>} : vector<512x64xbf16>, vector<64x128xbf16>, vector<512x128xf32> -> vector<512x128xf32>
    %c0_21 = arith.constant 0 : index
    %c0_22 = arith.constant 0 : index
    %28 = vector.load %arg9[%c0_21, %c0_22] : memref<1x128xf32, #tpu.memory_space<vmem>>, vector<1x128xf32>
    %29 = vector.broadcast %28 : vector<1x128xf32> to vector<512x128xf32>
    %30 = arith.addf %27, %29 : vector<512x128xf32>
    %cst_23 = arith.constant 0.000000e+00 : f32
    %31 = vector.broadcast %cst_23 : f32 to vector<512x128xf32>
    %32 = arith.maximumf %30, %31 : vector<512x128xf32>
    %c0_24 = arith.constant 0 : index
    %c0_25 = arith.constant 0 : index
    %33 = vector.load %arg10[%c0_24, %c0_25] : memref<8x128xf32, #tpu.memory_space<vmem>>, vector<8x128xf32>
    %cst_26 = arith.constant dense<0.000000e+00> : vector<8x512xf32>
    %34 = tpu.matmul %33, %32, %cst_26 {dimension_numbers = #tpu.dot_dimension_numbers<[1], [1], [0], [0], [0, 0, 1, 0], [], []>} : vector<8x128xf32>, vector<512x128xf32>, vector<8x512xf32> -> vector<8x512xf32>
    %35 = vector.extract_strided_slice %34 {offsets = [0, 0], sizes = [1, 512], strides = [1, 1]} : vector<8x512xf32> to vector<1x512xf32>
    %c0_27 = arith.constant 0 : index
    %c0_28 = arith.constant 0 : index
    %36 = vector.load %arg11[%c0_27, %c0_28] : memref<1x1xf32, #tpu.memory_space<vmem>>, vector<1x1xf32>
    %37 = vector.broadcast %36 : vector<1x1xf32> to vector<1x512xf32>
    %38 = arith.addf %35, %37 : vector<1x512xf32>
    %cst_29 = arith.constant 0.000000e+00 : f32
    %39 = vector.broadcast %cst_29 : f32 to vector<1x512xf32>
    %40 = arith.subf %39, %38 : vector<1x512xf32>
    %41 = math.exp %40 : vector<1x512xf32>
    %cst_30 = arith.constant 1.000000e+00 : f32
    %42 = vector.broadcast %cst_30 : f32 to vector<1x512xf32>
    %43 = arith.addf %42, %41 : vector<1x512xf32>
    %cst_31 = arith.constant 1.000000e+00 : f32
    %44 = vector.broadcast %cst_31 : f32 to vector<1x512xf32>
    %45 = arith.divf %44, %43 : vector<1x512xf32>
    %c0_32 = arith.constant 0 : index
    %c0_33 = arith.constant 0 : index
    %46 = vector.load %arg12[%c0_32, %c0_33] : memref<1x512xf32, #tpu.memory_space<vmem>>, vector<1x512xf32>
    tpu.vector_store %arg12[%c0_32, %c0_33], %45 {strides = array<i32>} : memref<1x512xf32, #tpu.memory_space<vmem>>, vector<1x512xf32>,
    return
  }
  func.func @transform_0(%arg0: i32) -> (i32, i32) {
    %c0_i32 = arith.constant 0 : i32
    %c0_i32_0 = arith.constant 0 : i32
    return %arg0, %c0_i32 : i32, i32
  }
  func.func @transform_1(%arg0: i32) -> (i32, i32) {
    %c0_i32 = arith.constant 0 : i32
    %c0_i32_0 = arith.constant 0 : i32
    %c0_i32_1 = arith.constant 0 : i32
    return %c0_i32, %c0_i32_0 : i32, i32
  }
  func.func @transform_2(%arg0: i32) -> (i32, i32) {
    %c0_i32 = arith.constant 0 : i32
    %c0_i32_0 = arith.constant 0 : i32
    %c0_i32_1 = arith.constant 0 : i32
    return %c0_i32, %c0_i32_0 : i32, i32
  }
  func.func @transform_3(%arg0: i32) -> (i32, i32) {
    %c0_i32 = arith.constant 0 : i32
    %c0_i32_0 = arith.constant 0 : i32
    %c0_i32_1 = arith.constant 0 : i32
    return %c0_i32, %c0_i32_0 : i32, i32
  }
  func.func @transform_4(%arg0: i32) -> (i32, i32) {
    %c0_i32 = arith.constant 0 : i32
    %c0_i32_0 = arith.constant 0 : i32
    %c0_i32_1 = arith.constant 0 : i32
    return %c0_i32, %c0_i32_0 : i32, i32
  }
  func.func @transform_5(%arg0: i32) -> (i32, i32) {
    %c0_i32 = arith.constant 0 : i32
    %c0_i32_0 = arith.constant 0 : i32
    %c0_i32_1 = arith.constant 0 : i32
    return %c0_i32, %c0_i32_0 : i32, i32
  }
  func.func @transform_6(%arg0: i32) -> (i32, i32) {
    %c0_i32 = arith.constant 0 : i32
    %c0_i32_0 = arith.constant 0 : i32
    %c0_i32_1 = arith.constant 0 : i32
    return %c0_i32, %c0_i32_0 : i32, i32
  }
  func.func @transform_7(%arg0: i32) -> (i32, i32) {
    %c0_i32 = arith.constant 0 : i32
    %c0_i32_0 = arith.constant 0 : i32
    %c0_i32_1 = arith.constant 0 : i32
    return %c0_i32, %c0_i32_0 : i32, i32
  }
  func.func @transform_8(%arg0: i32) -> (i32, i32) {
    %c0_i32 = arith.constant 0 : i32
    %c0_i32_0 = arith.constant 0 : i32
    %c0_i32_1 = arith.constant 0 : i32
    return %c0_i32, %c0_i32_0 : i32, i32
  }
  func.func @transform_9(%arg0: i32) -> (i32, i32) {
    %c0_i32 = arith.constant 0 : i32
    %c0_i32_0 = arith.constant 0 : i32
    %c0_i32_1 = arith.constant 0 : i32
    return %c0_i32, %c0_i32_0 : i32, i32
  }
  func.func @transform_10(%arg0: i32) -> (i32, i32) {
    %c0_i32 = arith.constant 0 : i32
    %c0_i32_0 = arith.constant 0 : i32
    %c0_i32_1 = arith.constant 0 : i32
    return %c0_i32, %c0_i32_0 : i32, i32
  }
  func.func @transform_11(%arg0: i32) -> (i32, i32) {
    %c0_i32 = arith.constant 0 : i32
    %c0_i32_0 = arith.constant 0 : i32
    return %c0_i32, %arg0 : i32, i32
  }
}

</mosaic_0001>

<bundles_post_ra>
// kernel: nba_rebound_forward.1
= control target key start
LH: loop header
LB: loop body
LE: loop exit
PB: predicated region body
PF: predicated region fallthrough
CT: control target
= control target key end

     0   :  { %vm160_vm0 = vcmask 261120   ;;  %vm1137_vm1 = vcmask 523264   ;;  %s3794_s1 = inlined_call_operand.vmem [shape: bf16[32,128], index: 1, kind: input, shape index: {}]   ;;  %s3795_s0 = inlined_call_operand.vmem [shape: f32[512,32], index: 0, kind: input, shape index: {}]   ;;  %s3796_s3 = inlined_call_operand.vmem [shape: bf16[128,64], index: 3, kind: input, shape index: {}]   ;;  %s3797_s2 = inlined_call_operand.vmem [shape: f32[1,128], index: 2, kind: input, shape index: {}]   ;;  %s3798_s5 = inlined_call_operand.vmem [shape: bf16[64,64], index: 5, kind: input, shape index: {}]   ;;  %s3799_s4 = inlined_call_operand.vmem [shape: f32[1,64], index: 4, kind: input, shape index: {}]   ;;  %s3800_s7 = inlined_call_operand.vmem [shape: bf16[64,128], index: 7, kind: input, shape index: {}]   ;;  %s3801_s6 = inlined_call_operand.vmem [shape: f32[1,64], index: 6, kind: input, shape index: {}]   ;;  %s3802_s8 = inlined_call_operand.vmem [shape: f32[1,128], index: 8, kind: input, shape index: {}]   ;;  %s3803_s9 = inlined_call_operand.vmem [shape: f32[8,128], index: 9, kind: input, shape index: {}]   ;;  %s3804_s10 = inlined_call_operand.<no memory space> [shape: f32[1,1], index: 10, kind: input, shape index: {}]   ;;  %s3805_s11 = inlined_call_operand.vmem [shape: f32[1,512], index: 11, kind: output, shape index: {}]  }
   0x1   :  { %v3017_v0 = vld [vmem:[%s3794_s1] sm:$0xff]   ;;  %v3018_v1 = vld [vmem:[%s3794_s1 + $0x8] sm:$0xff]   ;;  %v43_v5 = vld [vmem:[%s3795_s0 + $0x10] sm:$0xff] }
   0x2   :  { %2658 = vmatprep.subr.bf16.mxu0 %v3017_v0  ;;  %v41_v2 = vld [vmem:[%s3795_s0] sm:$0xff]  ;;  %v42_v3 = vld [vmem:[%s3795_s0 + $0x8] sm:$0xff]  ;;  %v44_v6 = vld [vmem:[%s3795_s0 + $0x18] sm:$0xff] }
   0x3   :  { %2659 = vmatpush3.bf16.msra.mxu0 %v3017_v0  ;;  %v105_v4 = vpack.c.bf16 %v42_v3, %v41_v2  ;;  %v45_v7 = vld [vmem:[%s3795_s0 + $0x20] sm:$0xff]  ;;  %v46_v8 = vld [vmem:[%s3795_s0 + $0x28] sm:$0xff]  ;;  %v106_v9 = vpack.c.bf16 %v44_v6, %v43_v5  ;;  %v47_v11 = vld [vmem:[%s3795_s0 + $0x30] sm:$0xff] }
   0x4   :  { %2660 = vmatprep.subr.bf16.mxu0 %v3018_v1  ;;  %v107_v10 = vpack.c.bf16 %v46_v8, %v45_v7  ;;  %v48_v12 = vld [vmem:[%s3795_s0 + $0x38] sm:$0xff]  ;;  %v49_v13 = vld [vmem:[%s3795_s0 + $0x40] sm:$0xff]  ;;  %v50_v14 = vld [vmem:[%s3795_s0 + $0x48] sm:$0xff] }
   0x5   :  { %2662 = vmatprep.mubr.msk.bf16.mxu0 %vm160_vm0, %v105_v4  ;;  %v108_v15 = vpack.c.bf16 %v48_v12, %v47_v11  ;;  %v109_v16 = vpack.c.bf16 %v50_v14, %v49_v13  ;;  %v51_v17 = vld [vmem:[%s3795_s0 + $0x50] sm:$0xff]  ;;  %v52_v18 = vld [vmem:[%s3795_s0 + $0x58] sm:$0xff]  ;;  %v53_v19 = vld [vmem:[%s3795_s0 + $0x60] sm:$0xff] }
   0x6   :  { %v54_v20 = vld [vmem:[%s3795_s0 + $0x68] sm:$0xff]  ;;  %v110_v21 = vpack.c.bf16 %v52_v18, %v51_v17  ;;  %v3019_v23 = vld [vmem:[%s3796_s3] sm:$0xff]   ;;  %v55_v24 = vld [vmem:[%s3795_s0 + $0x70] sm:$0xff] }
   0x7   :  { %2661 = vmatpush3.bf16.msra.mxu0 %v3018_v1  ;;  %v111_v22 = vpack.c.bf16 %v54_v20, %v53_v19  ;;  %v56_v25 = vld [vmem:[%s3795_s0 + $0x78] sm:$0xff]  ;;  %v3020_v26 = vld [vmem:[%s3796_s3 + $0x8] sm:$0xff]   ;;  %v57_v27 = vld [vmem:[%s3795_s0 + $0x80] sm:$0xff]  ;;  %2726 = vmatprep.subr.bf16.mxu1 %v3019_v23 }
   0x8   :  { %v58_v28 = vld [vmem:[%s3795_s0 + $0x88] sm:$0xff]  ;;  %2727 = vmatpush3.bf16.msra.mxu1 %v3019_v23  ;;  %v3021_v29 = vld [vmem:[%s3796_s3 + $0x10] sm:$0xff]   ;;  %v112_v30 = vpack.c.bf16 %v56_v25, %v55_v24  ;;  %v3022_v32 = vld [vmem:[%s3796_s3 + $0x18] sm:$0xff]  }
   0x9   :  { %2728 = vmatprep.subr.bf16.mxu1 %v3020_v26  ;;  %v113_v31 = vpack.c.bf16 %v58_v28, %v57_v27  ;;  %v59_v33 = vld [vmem:[%s3795_s0 + $0x90] sm:$0xff]  ;;  %v60_v34 = vld [vmem:[%s3795_s0 + $0x98] sm:$0xff]  ;;  %v61_v35 = vld [vmem:[%s3795_s0 + $0xa0] sm:$0xff] }
   0xa   :  { %2663 = vmatmul.mubr.msk.bf16.vlgmr.msra.gmra.mrb[0].mxu0 %vm160_vm0, %v106_v9  ;;  %v62_v36 = vld [vmem:[%s3795_s0 + $0xa8] sm:$0xff]  ;;  %v3023_v37 = vld [vmem:[%s3796_s3 + $0x20] sm:$0xff]   ;;  %v114_v38 = vpack.c.bf16 %v60_v34, %v59_v33  ;;  %v63_v41 = vld [vmem:[%s3795_s0 + $0xb0] sm:$0xff] }
   0xb   :  { %2666 = vmatprep.mubr.msk.bf16.mxu0 %vm160_vm0, %v107_v10  ;;  %v115_v39 = vpack.c.bf16 %v62_v36, %v61_v35  ;;  %v3024_v40 = vld [vmem:[%s3796_s3 + $0x28] sm:$0xff]   ;;  %v64_v42 = vld [vmem:[%s3795_s0 + $0xb8] sm:$0xff]  ;;  %v65_v43 = vld [vmem:[%s3795_s0 + $0xc0] sm:$0xff] }
   0xc   :  { %2729 = vmatpush3.bf16.msra.mxu1 %v3020_v26  ;;  %v66_v44 = vld [vmem:[%s3795_s0 + $0xc8] sm:$0xff]  ;;  %v116_v45 = vpack.c.bf16 %v64_v42, %v63_v41  ;;  %v67_v47 = vld [vmem:[%s3795_s0 + $0xd0] sm:$0xff]  ;;  %v68_v48 = vld [vmem:[%s3795_s0 + $0xd8] sm:$0xff] }
   0xd   :  { %2730 = vmatprep.subr.bf16.mxu1 %v3021_v29  ;;  %v117_v46 = vpack.c.bf16 %v66_v44, %v65_v43  ;;  %v69_v49 = vld [vmem:[%s3795_s0 + $0xe0] sm:$0xff]  ;;  %v70_v50 = vld [vmem:[%s3795_s0 + $0xe8] sm:$0xff]  ;;  %v118_v51 = vpack.c.bf16 %v68_v48, %v67_v47  ;;  %v71_v53 = vld [vmem:[%s3795_s0 + $0xf0] sm:$0xff] }
   0xe   :  { %v119_v52 = vpack.c.bf16 %v70_v50, %v69_v49  ;;  %v72_v54 = vld [vmem:[%s3795_s0 + $0xf8] sm:$0xff]  ;;  %v73_v55 = vld [vmem:[%s3795_s0 + $0x100] sm:$0xff]  ;;  %v74_v56 = vld [vmem:[%s3795_s0 + $0x108] sm:$0xff] }
   0xf   :  { %v120_v57 = vpack.c.bf16 %v72_v54, %v71_v53  ;;  %v121_v58 = vpack.c.bf16 %v74_v56, %v73_v55  ;;  %v75_v59 = vld [vmem:[%s3795_s0 + $0x110] sm:$0xff]  ;;  %v76_v60 = vld [vmem:[%s3795_s0 + $0x118] sm:$0xff]  ;;  %v77_v61 = vld [vmem:[%s3795_s0 + $0x120] sm:$0xff] }
  0x10   :  { %2731 = vmatpush3.bf16.msra.mxu1 %v3021_v29  ;;  %v78_v62 = vld [vmem:[%s3795_s0 + $0x128] sm:$0xff]  ;;  %v122_v63 = vpack.c.bf16 %v76_v60, %v75_v59  ;;  %v79_v1 = vld [vmem:[%s3795_s0 + $0x130] sm:$0xff]  ;;  %v80_v2 = vld [vmem:[%s3795_s0 + $0x138] sm:$0xff] }
  0x11   :  { %2732 = vmatprep.subr.bf16.mxu1 %v3022_v32  ;;  %v123_v0 = vpack.c.bf16 %v78_v62, %v77_v61  ;;  %v81_v3 = vld [vmem:[%s3795_s0 + $0x140] sm:$0xff]  ;;  %v82_v4 = vld [vmem:[%s3795_s0 + $0x148] sm:$0xff]  ;;  %v124_v5 = vpack.c.bf16 %v80_v2, %v79_v1  ;;  %v83_v7 = vld [vmem:[%s3795_s0 + $0x150] sm:$0xff] }
  0x12   :  { %2667 = vmatmul.mubr.msk.bf16.gmra.mrb[4].mxu0 %vm160_vm0, %v108_v15  ;;  %v125_v6 = vpack.c.bf16 %v82_v4, %v81_v3  ;;  %v84_v8 = vld [vmem:[%s3795_s0 + $0x158] sm:$0xff]  ;;  %v85_v9 = vld [vmem:[%s3795_s0 + $0x160] sm:$0xff]  ;;  %v86_v10 = vld [vmem:[%s3795_s0 + $0x168] sm:$0xff] }
  0x13   :  { %2670 = vmatprep.mubr.msk.bf16.mxu0 %vm160_vm0, %v109_v16  ;;  %v126_v11 = vpack.c.bf16 %v84_v8, %v83_v7  ;;  %v127_v12 = vpack.c.bf16 %v86_v10, %v85_v9  ;;  %v87_v13 = vld [vmem:[%s3795_s0 + $0x170] sm:$0xff]  ;;  %v88_v14 = vld [vmem:[%s3795_s0 + $0x178] sm:$0xff]  ;;  %v89_v15 = vld [vmem:[%s3795_s0 + $0x180] sm:$0xff] }
  0x14   :  { %2733 = vmatpush3.bf16.msra.mxu1 %v3022_v32  ;;  %v90_v16 = vld [vmem:[%s3795_s0 + $0x188] sm:$0xff]  ;;  %v128_v17 = vpack.c.bf16 %v88_v14, %v87_v13  ;;  %v3025_v18 = vld [vmem:[%s3796_s3 + $0x30] sm:$0xff]   ;;  %v3026_v20 = vld [vmem:[%s3796_s3 + $0x38] sm:$0xff]  }
  0x15   :  { %2734 = vmatprep.subr.bf16.mxu1 %v3023_v37  ;;  %v129_v19 = vpack.c.bf16 %v90_v16, %v89_v15  ;;  %v93_v23 = vld [vmem:[%s3795_s0 + $0x1a0] sm:$0xff]  ;;  %v94_v24 = vld [vmem:[%s3795_s0 + $0x1a8] sm:$0xff]  ;;  %v95_v27 = vld [vmem:[%s3795_s0 + $0x1b0] sm:$0xff] }
  0x16   :  { %v131_v26 = vpack.c.bf16 %v94_v24, %v93_v23  ;;  %v96_v28 = vld [vmem:[%s3795_s0 + $0x1b8] sm:$0xff]  ;;  %v97_v29 = vld [vmem:[%s3795_s0 + $0x1c0] sm:$0xff]  ;;  %v99_v33 = vld [vmem:[%s3795_s0 + $0x1d0] sm:$0xff] }
  0x17   :  { %v100_v34 = vld [vmem:[%s3795_s0 + $0x1d8] sm:$0xff]  ;;  %v101_v35 = vld [vmem:[%s3795_s0 + $0x1e0] sm:$0xff]  ;;  %v102_v36 = vld [vmem:[%s3795_s0 + $0x1e8] sm:$0xff] }
  0x18   :  { %2735 = vmatpush3.bf16.msra.mxu1 %v3023_v37  ;;  %v134_v37 = vpack.c.bf16 %v100_v34, %v99_v33  ;;  %v3370_v42 = vld [vmem:[%s3797_s2] ss:$0 sm:$0xff]  ;;  %v3028_v54 = vld [vmem:[%s3798_s5 + $0x8] sm:$0xff]  }
  0x19   :  { %2736 = vmatprep.subr.bf16.mxu1 %v3024_v40 }
  0x1a   :  { %2671 = vmatmul.mubr.msk.bf16.gmra.mrb[8].mxu0 %vm160_vm0, %v110_v21  ;;  %v91_v21 = vld [vmem:[%s3795_s0 + $0x190] sm:$0xff] }
  0x1b   :  { %2674 = vmatprep.mubr.msk.bf16.mxu0 %vm160_vm0, %v111_v22  ;;  %v92_v22 = vld [vmem:[%s3795_s0 + $0x198] sm:$0xff] }
  0x1c   :  { %2737 = vmatpush3.bf16.msra.mxu1 %v3024_v40  ;;  %v130_v25 = vpack.c.bf16 %v92_v22, %v91_v21  ;;  %v104_v40 = vld [vmem:[%s3795_s0 + $0x1f8] sm:$0xff] }
  0x1d   :  { %2738 = vmatprep.subr.bf16.mxu1 %v3025_v18 }
  0x20   :  { %2739 = vmatpush3.bf16.msra.mxu1 %v3025_v18 }
  0x21   :  { %2740 = vmatprep.subr.bf16.mxu1 %v3026_v20 }
  0x22   :  { %2675 = vmatmul.mubr.msk.bf16.gmra.mrb[12].mxu0 %vm160_vm0, %v112_v30  ;;  %v98_v30 = vld [vmem:[%s3795_s0 + $0x1c8] sm:$0xff] }
  0x23   :  { %2678 = vmatprep.mubr.msk.bf16.mxu0 %vm160_vm0, %v113_v31  ;;  %v132_v31 = vpack.c.bf16 %v96_v28, %v95_v27  ;;  %v133_v32 = vpack.c.bf16 %v98_v30, %v97_v29 }
  0x24   :  { %2741 = vmatpush3.bf16.msra.mxu1 %v3026_v20 }
  0x2a   :  { %2679 = vmatmul.mubr.msk.bf16.gmra.mrb[16].mxu0 %vm160_vm0, %v114_v38  ;;  %v135_v38 = vpack.c.bf16 %v102_v36, %v101_v35 }
  0x2b   :  { %2682 = vmatprep.mubr.msk.bf16.mxu0 %vm160_vm0, %v115_v39  ;;  %v103_v39 = vld [vmem:[%s3795_s0 + $0x1f0] sm:$0xff] }
  0x2c   :  { %v136_v41 = vpack.c.bf16 %v104_v40, %v103_v39 }
  0x32   :  { %2683 = vmatmul.mubr.msk.bf16.gmra.mrb[20].mxu0 %vm160_vm0, %v116_v45 }
  0x33   :  { %2686 = vmatprep.mubr.msk.bf16.mxu0 %vm160_vm0, %v117_v46 }
  0x3a   :  { %2687 = vmatmul.mubr.msk.bf16.gmra.mrb[24].mxu0 %vm160_vm0, %v118_v51 }
  0x3b   :  { %2690 = vmatprep.mubr.msk.bf16.mxu0 %vm160_vm0, %v119_v52  ;;  %v3027_v52 = vld [vmem:[%s3798_s5] sm:$0xff]  }
  0x3c   :  { %2806 = vmatprep.subr.bf16.mxu0 %v3027_v52 }
  0x3d   :  { %2807 = vmatpush3.bf16.msra.mxu0 %v3027_v52 }
  0x3e   :  { %2808 = vmatprep.subr.bf16.mxu0 %v3028_v54 }
  0x41   :  { %2809 = vmatpush3.bf16.msra.mxu0 %v3028_v54 }
  0x42   :  { %2691 = vmatmul.mubr.msk.bf16.gmra.mrb[28].mxu0 %vm160_vm0, %v120_v57 }
  0x43   :  { %2694 = vmatprep.mubr.msk.bf16.mxu0 %vm160_vm0, %v121_v58 }
  0x4a   :  { %2695 = vmatmul.mubr.msk.bf16.gmra.mrb[32].mxu0 %vm160_vm0, %v122_v63 }
  0x4b   :  { %2698 = vmatprep.mubr.msk.bf16.mxu0 %vm160_vm0, %v123_v0 }
  0x52   :  { %2699 = vmatmul.mubr.msk.bf16.gmra.mrb[36].mxu0 %vm160_vm0, %v124_v5 }
  0x53   :  { %2702 = vmatprep.mubr.msk.bf16.mxu0 %vm160_vm0, %v125_v6 }
  0x5a   :  { %2703 = vmatmul.mubr.msk.bf16.gmra.mrb[40].mxu0 %vm160_vm0, %v126_v11 }
  0x5b   :  { %2706 = vmatprep.mubr.msk.bf16.mxu0 %vm160_vm0, %v127_v12 }
  0x62   :  { %2707 = vmatmul.mubr.msk.bf16.gmra.mrb[44].mxu0 %vm160_vm0, %v128_v17 }
  0x63   :  { %2710 = vmatprep.mubr.msk.bf16.mxu0 %vm160_vm0, %v129_v19 }
  0x6a   :  { %2711 = vmatmul.mubr.msk.bf16.gmra.mrb[48].mxu0 %vm160_vm0, %v130_v25 }
  0x6b   :  { %2714 = vmatprep.mubr.msk.bf16.mxu0 %vm160_vm0, %v131_v26 }
  0x72   :  { %2715 = vmatmul.mubr.msk.bf16.gmra.mrb[52].mxu0 %vm160_vm0, %v132_v31 }
  0x73   :  { %2718 = vmatprep.mubr.msk.bf16.mxu0 %vm160_vm0, %v133_v32 }
  0x7a   :  { %2719 = vmatmul.mubr.msk.bf16.gmra.mrb[56].mxu0 %vm160_vm0, %v134_v37 }
  0x7b   :  { %2722 = vmatprep.mubr.msk.bf16.mxu0 %vm160_vm0, %v135_v38 }
  0x82   :  { %2723 = vmatmul.mubr.msk.bf16.gmra.mrb[60].mxu0 %vm160_vm0, %v136_v41 }
  0xdd   :  { %v2664_v43 = vpop.f32.mrb[0].mxu0 }
  0xde   :  { %v300_v44 = vadd.f32 %v2664_v43, %v3370_v42  ;;  %v291_v45 = vpop.f32.mrb[1].mxu0 }
  0xdf   :  { %v292_v46 = vadd.f32 %v3370_v42, %v291_v45  ;;  %v2665_v47 = vpop.f32.mrb[2].mxu0 }
  0xe0   :  { %v303_v48 = vadd.f32 %v2665_v47, %v3370_v42  ;;  %v294_v49 = vpop.f32.mrb[3].mxu0  ;;  %v548_v50 = vmax.f32 %v300_v44, 0.0 }
  0xe1   :  { %v295_v51 = vadd.f32 %v3370_v42, %v294_v49  ;;  %v546_v55 = vmax.f32 %v292_v46, 0.0 }
  0xe2   :  { %v549_v53 = vmax.f32 %v303_v48, 0.0 }
  0xe3   :  { %v547_v56 = vmax.f32 %v295_v51, 0.0 }
  0xe4   :  { %v611_v57 = vpack.c.bf16 %v549_v53, %v548_v50 }
  0xe5   :  { %v2668_v58 = vpop.f32.mrb[4].mxu0  ;;  %v610_v59 = vpack.c.bf16 %v547_v56, %v546_v55 }
  0xe6   :  { %v316_v60 = vadd.f32 %v2668_v58, %v3370_v42  ;;  %v307_v61 = vpop.f32.mrb[5].mxu0 }
  0xe7   :  { %v308_v62 = vadd.f32 %v3370_v42, %v307_v61  ;;  %v2669_v63 = vpop.f32.mrb[6].mxu0  ;;  %2742 = vmatprep.mubr.bf16.mxu1 %v610_v59 }
  0xe8   :  { %v319_v0 = vadd.f32 %v2669_v63, %v3370_v42  ;;  %v310_v1 = vpop.f32.mrb[7].mxu0  ;;  %2743 = vmatmul.mubr.bf16.vlgmr.msra.gmra.mrb[0].mxu1 %v611_v57  ;;  %v552_v3 = vmax.f32 %v316_v60, 0.0 }
  0xe9   :  { %v311_v2 = vadd.f32 %v3370_v42, %v310_v1  ;;  %v550_v5 = vmax.f32 %v308_v62, 0.0 }
  0xea   :  { %v553_v4 = vmax.f32 %v319_v0, 0.0 }
  0xeb   :  { %v551_v6 = vmax.f32 %v311_v2, 0.0 }
  0xec   :  { %v613_v7 = vpack.c.bf16 %v553_v4, %v552_v3 }
  0xed   :  { %v612_v8 = vpack.c.bf16 %v551_v6, %v550_v5  ;;  %v2672_v9 = vpop.f32.mrb[8].mxu0 }
  0xee   :  { %v332_v10 = vadd.f32 %v2672_v9, %v3370_v42  ;;  %v323_v11 = vpop.f32.mrb[9].mxu0 }
  0xef   :  { %v324_v12 = vadd.f32 %v3370_v42, %v323_v11  ;;  %v2673_v13 = vpop.f32.mrb[10].mxu0  ;;  %2746 = vmatprep.mubr.bf16.mxu1 %v612_v8 }
  0xf0   :  { %v335_v14 = vadd.f32 %v2673_v13, %v3370_v42  ;;  %v326_v15 = vpop.f32.mrb[11].mxu0  ;;  %2747 = vmatmul.mubr.bf16.gmra.mrb[4].mxu1 %v613_v7  ;;  %v556_v17 = vmax.f32 %v332_v10, 0.0 }
  0xf1   :  { %v327_v16 = vadd.f32 %v3370_v42, %v326_v15  ;;  %v554_v19 = vmax.f32 %v324_v12, 0.0 }
  0xf2   :  { %v557_v18 = vmax.f32 %v335_v14, 0.0 }
  0xf3   :  { %v555_v20 = vmax.f32 %v327_v16, 0.0 }
  0xf4   :  { %v615_v21 = vpack.c.bf16 %v557_v18, %v556_v17 }
  0xf5   :  { %v614_v22 = vpack.c.bf16 %v555_v20, %v554_v19  ;;  %v2676_v23 = vpop.f32.mrb[12].mxu0 }
  0xf6   :  { %v348_v24 = vadd.f32 %v2676_v23, %v3370_v42  ;;  %v339_v25 = vpop.f32.mrb[13].mxu0 }
  0xf7   :  { %v340_v26 = vadd.f32 %v3370_v42, %v339_v25  ;;  %v2677_v27 = vpop.f32.mrb[14].mxu0  ;;  %2750 = vmatprep.mubr.bf16.mxu1 %v614_v22 }
  0xf8   :  { %v351_v28 = vadd.f32 %v2677_v27, %v3370_v42  ;;  %v342_v29 = vpop.f32.mrb[15].mxu0  ;;  %2751 = vmatmul.mubr.bf16.gmra.mrb[8].mxu1 %v615_v21  ;;  %v560_v31 = vmax.f32 %v348_v24, 0.0 }
  0xf9   :  { %v343_v30 = vadd.f32 %v3370_v42, %v342_v29  ;;  %v558_v33 = vmax.f32 %v340_v26, 0.0 }
  0xfa   :  { %v561_v32 = vmax.f32 %v351_v28, 0.0 }
  0xfb   :  { %v559_v34 = vmax.f32 %v343_v30, 0.0 }
  0xfc   :  { %v617_v35 = vpack.c.bf16 %v561_v32, %v560_v31 }
  0xfd   :  { %v616_v36 = vpack.c.bf16 %v559_v34, %v558_v33  ;;  %v2680_v37 = vpop.f32.mrb[16].mxu0 }
  0xfe   :  { %v364_v38 = vadd.f32 %v2680_v37, %v3370_v42  ;;  %v355_v39 = vpop.f32.mrb[17].mxu0 }
  0xff   :  { %v356_v40 = vadd.f32 %v3370_v42, %v355_v39  ;;  %v2681_v41 = vpop.f32.mrb[18].mxu0  ;;  %2754 = vmatprep.mubr.bf16.mxu1 %v616_v36 }
 0x100   :  { %v367_v43 = vadd.f32 %v2681_v41, %v3370_v42  ;;  %v358_v44 = vpop.f32.mrb[19].mxu0  ;;  %2755 = vmatmul.mubr.bf16.gmra.mrb[12].mxu1 %v617_v35  ;;  %v564_v46 = vmax.f32 %v364_v38, 0.0 }
 0x101   :  { %v359_v45 = vadd.f32 %v3370_v42, %v358_v44  ;;  %v562_v48 = vmax.f32 %v356_v40, 0.0 }
 0x102   :  { %v565_v47 = vmax.f32 %v367_v43, 0.0 }
 0x103   :  { %v563_v49 = vmax.f32 %v359_v45, 0.0 }
 0x104   :  { %v619_v50 = vpack.c.bf16 %v565_v47, %v564_v46 }
 0x105   :  { %v618_v51 = vpack.c.bf16 %v563_v49, %v562_v48  ;;  %v2684_v52 = vpop.f32.mrb[20].mxu0 }
 0x106   :  { %v380_v53 = vadd.f32 %v2684_v52, %v3370_v42  ;;  %v371_v54 = vpop.f32.mrb[21].mxu0 }
 0x107   :  { %v372_v55 = vadd.f32 %v3370_v42, %v371_v54  ;;  %v2685_v56 = vpop.f32.mrb[22].mxu0  ;;  %2758 = vmatprep.mubr.bf16.mxu1 %v618_v51 }
 0x108   :  { %v383_v57 = vadd.f32 %v2685_v56, %v3370_v42  ;;  %v374_v58 = vpop.f32.mrb[23].mxu0  ;;  %2759 = vmatmul.mubr.bf16.gmra.mrb[16].mxu1 %v619_v50  ;;  %v568_v60 = vmax.f32 %v380_v53, 0.0 }
 0x109   :  { %v375_v59 = vadd.f32 %v3370_v42, %v374_v58  ;;  %v566_v62 = vmax.f32 %v372_v55, 0.0 }
 0x10a   :  { %v569_v61 = vmax.f32 %v383_v57, 0.0 }
 0x10b   :  { %v567_v63 = vmax.f32 %v375_v59, 0.0 }
 0x10c   :  { %v621_v0 = vpack.c.bf16 %v569_v61, %v568_v60 }
 0x10d   :  { %v620_v1 = vpack.c.bf16 %v567_v63, %v566_v62  ;;  %v2688_v2 = vpop.f32.mrb[24].mxu0 }
 0x10e   :  { %v396_v3 = vadd.f32 %v2688_v2, %v3370_v42  ;;  %v387_v4 = vpop.f32.mrb[25].mxu0 }
 0x10f   :  { %v388_v5 = vadd.f32 %v3370_v42, %v387_v4  ;;  %v2689_v6 = vpop.f32.mrb[26].mxu0  ;;  %2762 = vmatprep.mubr.bf16.mxu1 %v620_v1 }
 0x110   :  { %v399_v7 = vadd.f32 %v2689_v6, %v3370_v42  ;;  %v390_v8 = vpop.f32.mrb[27].mxu0  ;;  %2763 = vmatmul.mubr.bf16.gmra.mrb[20].mxu1 %v621_v0  ;;  %v572_v10 = vmax.f32 %v396_v3, 0.0 }
 0x111   :  { %v391_v9 = vadd.f32 %v3370_v42, %v390_v8  ;;  %v570_v12 = vmax.f32 %v388_v5, 0.0 }
 0x112   :  { %v573_v11 = vmax.f32 %v399_v7, 0.0 }
 0x113   :  { %v571_v13 = vmax.f32 %v391_v9, 0.0 }
 0x114   :  { %v623_v14 = vpack.c.bf16 %v573_v11, %v572_v10 }
 0x115   :  { %v622_v15 = vpack.c.bf16 %v571_v13, %v570_v12  ;;  %v2692_v16 = vpop.f32.mrb[28].mxu0 }
 0x116   :  { %v412_v17 = vadd.f32 %v2692_v16, %v3370_v42  ;;  %v403_v18 = vpop.f32.mrb[29].mxu0 }
 0x117   :  { %v404_v19 = vadd.f32 %v3370_v42, %v403_v18  ;;  %v2693_v20 = vpop.f32.mrb[30].mxu0  ;;  %2766 = vmatprep.mubr.bf16.mxu1 %v622_v15 }
 0x118   :  { %v415_v21 = vadd.f32 %v2693_v20, %v3370_v42  ;;  %v406_v22 = vpop.f32.mrb[31].mxu0  ;;  %2767 = vmatmul.mubr.bf16.gmra.mrb[24].mxu1 %v623_v14  ;;  %v576_v24 = vmax.f32 %v412_v17, 0.0 }
 0x119   :  { %v407_v23 = vadd.f32 %v3370_v42, %v406_v22  ;;  %v574_v26 = vmax.f32 %v404_v19, 0.0  ;;  %v3029_v22 = vld [vmem:[%s3798_s5 + $0x10] sm:$0xff]  }
 0x11a   :  { %v577_v25 = vmax.f32 %v415_v21, 0.0  ;;  %2810 = vmatprep.subr.bf16.mxu0 %v3029_v22 }
 0x11b   :  { %v575_v27 = vmax.f32 %v407_v23, 0.0  ;;  %2811 = vmatpush3.bf16.msra.mxu0 %v3029_v22 }
 0x11c   :  { %v625_v28 = vpack.c.bf16 %v577_v25, %v576_v24 }
 0x11d   :  { %v624_v29 = vpack.c.bf16 %v575_v27, %v574_v26  ;;  %v2696_v30 = vpop.f32.mrb[32].mxu0 }
 0x11e   :  { %v428_v31 = vadd.f32 %v2696_v30, %v3370_v42  ;;  %v419_v32 = vpop.f32.mrb[33].mxu0 }
 0x11f   :  { %v420_v33 = vadd.f32 %v3370_v42, %v419_v32  ;;  %v2697_v34 = vpop.f32.mrb[34].mxu0  ;;  %2770 = vmatprep.mubr.bf16.mxu1 %v624_v29 }
 0x120   :  { %v431_v35 = vadd.f32 %v2697_v34, %v3370_v42  ;;  %v422_v36 = vpop.f32.mrb[35].mxu0  ;;  %2771 = vmatmul.mubr.bf16.gmra.mrb[28].mxu1 %v625_v28  ;;  %v580_v38 = vmax.f32 %v428_v31, 0.0  ;;  %v3030_v31 = vld [vmem:[%s3798_s5 + $0x18] sm:$0xff]  }
 0x121   :  { %v423_v37 = vadd.f32 %v3370_v42, %v422_v36  ;;  %v578_v40 = vmax.f32 %v420_v33, 0.0  ;;  %2812 = vmatprep.subr.bf16.mxu0 %v3030_v31 }
 0x122   :  { %v581_v39 = vmax.f32 %v431_v35, 0.0  ;;  %2813 = vmatpush3.bf16.msra.mxu0 %v3030_v31 }
 0x123   :  { %v579_v41 = vmax.f32 %v423_v37, 0.0 }
 0x124   :  { %v627_v43 = vpack.c.bf16 %v581_v39, %v580_v38 }
 0x125   :  { %v626_v44 = vpack.c.bf16 %v579_v41, %v578_v40  ;;  %v2700_v45 = vpop.f32.mrb[36].mxu0 }
 0x126   :  { %v444_v46 = vadd.f32 %v2700_v45, %v3370_v42  ;;  %v435_v47 = vpop.f32.mrb[37].mxu0 }
 0x127   :  { %v436_v48 = vadd.f32 %v3370_v42, %v435_v47  ;;  %v2701_v49 = vpop.f32.mrb[38].mxu0  ;;  %2774 = vmatprep.mubr.bf16.mxu1 %v626_v44 }
 0x128   :  { %v447_v50 = vadd.f32 %v2701_v49, %v3370_v42  ;;  %v438_v51 = vpop.f32.mrb[39].mxu0  ;;  %2775 = vmatmul.mubr.bf16.gmra.mrb[32].mxu1 %v627_v43  ;;  %v584_v53 = vmax.f32 %v444_v46, 0.0 }
 0x129   :  { %v439_v52 = vadd.f32 %v3370_v42, %v438_v51  ;;  %v582_v55 = vmax.f32 %v436_v48, 0.0 }
 0x12a   :  { %v585_v54 = vmax.f32 %v447_v50, 0.0 }
 0x12b   :  { %v583_v56 = vmax.f32 %v439_v52, 0.0 }
 0x12c   :  { %v629_v57 = vpack.c.bf16 %v585_v54, %v584_v53 }
 0x12d   :  { %v628_v58 = vpack.c.bf16 %v583_v56, %v582_v55  ;;  %v2704_v59 = vpop.f32.mrb[40].mxu0 }
 0x12e   :  { %v460_v60 = vadd.f32 %v2704_v59, %v3370_v42  ;;  %v451_v61 = vpop.f32.mrb[41].mxu0 }
 0x12f   :  { %v452_v62 = vadd.f32 %v3370_v42, %v451_v61  ;;  %v2705_v63 = vpop.f32.mrb[42].mxu0  ;;  %2778 = vmatprep.mubr.bf16.mxu1 %v628_v58 }
 0x130   :  { %v463_v0 = vadd.f32 %v2705_v63, %v3370_v42  ;;  %v454_v1 = vpop.f32.mrb[43].mxu0  ;;  %2779 = vmatmul.mubr.bf16.gmra.mrb[36].mxu1 %v629_v57  ;;  %v588_v3 = vmax.f32 %v460_v60, 0.0 }
 0x131   :  { %v455_v2 = vadd.f32 %v3370_v42, %v454_v1  ;;  %v586_v5 = vmax.f32 %v452_v62, 0.0 }
 0x132   :  { %v589_v4 = vmax.f32 %v463_v0, 0.0 }
 0x133   :  { %v587_v6 = vmax.f32 %v455_v2, 0.0 }
 0x134   :  { %v631_v7 = vpack.c.bf16 %v589_v4, %v588_v3 }
 0x135   :  { %v630_v8 = vpack.c.bf16 %v587_v6, %v586_v5  ;;  %v2708_v9 = vpop.f32.mrb[44].mxu0 }
 0x136   :  { %v476_v10 = vadd.f32 %v2708_v9, %v3370_v42  ;;  %v467_v11 = vpop.f32.mrb[45].mxu0 }
 0x137   :  { %v468_v12 = vadd.f32 %v3370_v42, %v467_v11  ;;  %v2709_v13 = vpop.f32.mrb[46].mxu0  ;;  %2782 = vmatprep.mubr.bf16.mxu1 %v630_v8 }
 0x138   :  { %v479_v14 = vadd.f32 %v2709_v13, %v3370_v42  ;;  %v470_v15 = vpop.f32.mrb[47].mxu0  ;;  %2783 = vmatmul.mubr.bf16.gmra.mrb[40].mxu1 %v631_v7  ;;  %v592_v17 = vmax.f32 %v476_v10, 0.0 }
 0x139   :  { %v471_v16 = vadd.f32 %v3370_v42, %v470_v15  ;;  %v590_v19 = vmax.f32 %v468_v12, 0.0 }
 0x13a   :  { %v593_v18 = vmax.f32 %v479_v14, 0.0 }
 0x13b   :  { %v591_v20 = vmax.f32 %v471_v16, 0.0 }
 0x13c   :  { %v633_v21 = vpack.c.bf16 %v593_v18, %v592_v17  ;;  %v3451_v18 = vld [vmem:[%s3799_s4] ss:$0 sm:$0xff] }
 0x13d   :  { %v632_v23 = vpack.c.bf16 %v591_v20, %v590_v19  ;;  %v2712_v24 = vpop.f32.mrb[48].mxu0 }
 0x13e   :  { %v492_v25 = vadd.f32 %v2712_v24, %v3370_v42  ;;  %v483_v26 = vpop.f32.mrb[49].mxu0 }
 0x13f   :  { %v484_v27 = vadd.f32 %v3370_v42, %v483_v26  ;;  %v2713_v28 = vpop.f32.mrb[50].mxu0  ;;  %2786 = vmatprep.mubr.bf16.mxu1 %v632_v23 }
 0x140   :  { %v495_v29 = vadd.f32 %v2713_v28, %v3370_v42  ;;  %v486_v30 = vpop.f32.mrb[51].mxu0  ;;  %2787 = vmatmul.mubr.bf16.gmra.mrb[44].mxu1 %v633_v21  ;;  %v596_v33 = vmax.f32 %v492_v25, 0.0 }
 0x141   :  { %v487_v32 = vadd.f32 %v3370_v42, %v486_v30  ;;  %v594_v35 = vmax.f32 %v484_v27, 0.0  ;;  %v3031_v27 = vld [vmem:[%s3800_s7] sm:$0xff]  }
 0x142   :  { %v597_v34 = vmax.f32 %v495_v29, 0.0  ;;  %v3032_v29 = vld [vmem:[%s3800_s7 + $0x8] sm:$0xff]   ;;  %2878 = vmatprep.subr.bf16.mxu1 %v3031_v27 }
 0x143   :  { %v595_v36 = vmax.f32 %v487_v32, 0.0  ;;  %2879 = vmatpush3.bf16.msra.mxu1 %v3031_v27 }
 0x144   :  { %v635_v37 = vpack.c.bf16 %v597_v34, %v596_v33  ;;  %2880 = vmatprep.subr.bf16.mxu1 %v3032_v29 }
 0x145   :  { %v634_v38 = vpack.c.bf16 %v595_v36, %v594_v35  ;;  %v2716_v39 = vpop.f32.mrb[52].mxu0 }
 0x146   :  { %v508_v40 = vadd.f32 %v2716_v39, %v3370_v42  ;;  %v499_v41 = vpop.f32.mrb[53].mxu0 }
 0x147   :  { %2790 = vmatprep.mubr.bf16.mxu1 %v634_v38  ;;  %v500_v43 = vadd.f32 %v3370_v42, %v499_v41  ;;  %v2717_v44 = vpop.f32.mrb[54].mxu0  ;;  %2881 = vmatpush3.bf16.msra.mxu1 %v3032_v29 }
 0x148   :  { %2791 = vmatmul.mubr.bf16.gmra.mrb[48].mxu1 %v635_v37  ;;  %v600_v45 = vmax.f32 %v508_v40, 0.0  ;;  %v511_v46 = vadd.f32 %v2717_v44, %v3370_v42  ;;  %v502_v47 = vpop.f32.mrb[55].mxu0 }
 0x149   :  { %v598_v48 = vmax.f32 %v500_v43, 0.0  ;;  %v503_v49 = vadd.f32 %v3370_v42, %v502_v47 }
 0x14a   :  { %v601_v50 = vmax.f32 %v511_v46, 0.0 }
 0x14b   :  { %v599_v51 = vmax.f32 %v503_v49, 0.0 }
 0x14c   :  { %v637_v52 = vpack.c.bf16 %v601_v50, %v600_v45 }
 0x14d   :  { %v636_v53 = vpack.c.bf16 %v599_v51, %v598_v48  ;;  %v2720_v54 = vpop.f32.mrb[56].mxu0 }
 0x14e   :  { %v524_v55 = vadd.f32 %v2720_v54, %v3370_v42  ;;  %v515_v56 = vpop.f32.mrb[57].mxu0 }
 0x14f   :  { %2794 = vmatprep.mubr.bf16.mxu1 %v636_v53  ;;  %v516_v57 = vadd.f32 %v3370_v42, %v515_v56  ;;  %v2721_v58 = vpop.f32.mrb[58].mxu0 }
 0x150   :  { %2795 = vmatmul.mubr.bf16.gmra.mrb[52].mxu1 %v637_v52  ;;  %v604_v59 = vmax.f32 %v524_v55, 0.0  ;;  %v527_v60 = vadd.f32 %v2721_v58, %v3370_v42  ;;  %v518_v61 = vpop.f32.mrb[59].mxu0 }
 0x151   :  { %v602_v62 = vmax.f32 %v516_v57, 0.0  ;;  %v519_v63 = vadd.f32 %v3370_v42, %v518_v61 }
 0x152   :  { %v605_v0 = vmax.f32 %v527_v60, 0.0 }
 0x153   :  { %v603_v1 = vmax.f32 %v519_v63, 0.0 }
 0x154   :  { %v639_v2 = vpack.c.bf16 %v605_v0, %v604_v59 }
 0x155   :  { %v638_v3 = vpack.c.bf16 %v603_v1, %v602_v62  ;;  %v2724_v4 = vpop.f32.mrb[60].mxu0 }
 0x156   :  { %v540_v5 = vadd.f32 %v2724_v4, %v3370_v42  ;;  %v531_v6 = vpop.f32.mrb[61].mxu0 }
 0x157   :  { %2798 = vmatprep.mubr.bf16.mxu1 %v638_v3  ;;  %v532_v7 = vadd.f32 %v3370_v42, %v531_v6  ;;  %v2725_v8 = vpop.f32.mrb[62].mxu0 }
 0x158   :  { %2799 = vmatmul.mubr.bf16.gmra.mrb[56].mxu1 %v639_v2  ;;  %v608_v9 = vmax.f32 %v540_v5, 0.0  ;;  %v543_v10 = vadd.f32 %v2725_v8, %v3370_v42  ;;  %v534_v11 = vpop.f32.mrb[63].mxu0 }
 0x159   :  { %v606_v12 = vmax.f32 %v532_v7, 0.0  ;;  %v535_v13 = vadd.f32 %v3370_v42, %v534_v11 }
 0x15a   :  { %v609_v14 = vmax.f32 %v543_v10, 0.0 }
 0x15b   :  { %v607_v15 = vmax.f32 %v535_v13, 0.0 }
 0x15c   :  { %v641_v16 = vpack.c.bf16 %v609_v14, %v608_v9 }
 0x15d   :  { %v640_v17 = vpack.c.bf16 %v607_v15, %v606_v12 }
 0x15f   :  { %2802 = vmatprep.mubr.bf16.mxu1 %v640_v17 }
 0x160   :  { %2803 = vmatmul.mubr.bf16.gmra.mrb[60].mxu1 %v641_v16 }
 0x1bb   :  { %v2744_v19 = vpop.f32.mrb[0].mxu1 }
 0x1bc   :  { %v756_v20 = vadd.f32 %v2744_v19, %v3451_v18  ;;  %v747_v21 = vpop.f32.mrb[1].mxu1 }
 0x1bd   :  { %v748_v22 = vadd.f32 %v3451_v18, %v747_v21  ;;  %v2745_v23 = vpop.f32.mrb[2].mxu1 }
 0x1be   :  { %v759_v42 = vadd.f32 %v2745_v23, %v3451_v18  ;;  %v750_v24 = vpop.f32.mrb[3].mxu1  ;;  %v1004_v25 = vmax.f32 %v756_v20, 0.0 }
 0x1bf   :  { %v751_v26 = vadd.f32 %v3451_v18, %v750_v24  ;;  %v1002_v30 = vmax.f32 %v748_v22, 0.0 }
 0x1c0   :  { %v1005_v28 = vmax.f32 %v759_v42, 0.0 }
 0x1c1   :  { %v1003_v31 = vmax.f32 %v751_v26, 0.0 }
 0x1c2   :  { %v1067_v32 = vpack.c.bf16 %v1005_v28, %v1004_v25 }
 0x1c3   :  { %v1066_v33 = vpack.c.bf16 %v1003_v31, %v1002_v30  ;;  %v2748_v34 = vpop.f32.mrb[4].mxu1 }
 0x1c4   :  { %v772_v35 = vadd.f32 %v2748_v34, %v3451_v18  ;;  %v763_v36 = vpop.f32.mrb[5].mxu1 }
 0x1c5   :  { %v764_v37 = vadd.f32 %v3451_v18, %v763_v36  ;;  %v2749_v38 = vpop.f32.mrb[6].mxu1  ;;  %2814 = vmatprep.mubr.msk.bf16.mxu0 %vm1137_vm1, %v1066_v33 }
 0x1c6   :  { %v775_v39 = vadd.f32 %v2749_v38, %v3451_v18  ;;  %v766_v40 = vpop.f32.mrb[7].mxu1  ;;  %2815 = vmatmul.mubr.msk.bf16.vlgmr.msra.gmra.mrb[64].mxu0 %vm1137_vm1, %v1067_v32  ;;  %v1008_v43 = vmax.f32 %v772_v35, 0.0 }
 0x1c7   :  { %v767_v41 = vadd.f32 %v3451_v18, %v766_v40  ;;  %v1006_v45 = vmax.f32 %v764_v37, 0.0 }
 0x1c8   :  { %v1009_v44 = vmax.f32 %v775_v39, 0.0 }
 0x1c9   :  { %v1007_v46 = vmax.f32 %v767_v41, 0.0 }
 0x1ca   :  { %v1069_v47 = vpack.c.bf16 %v1009_v44, %v1008_v43 }
 0x1cb   :  { %v1068_v48 = vpack.c.bf16 %v1007_v46, %v1006_v45  ;;  %v2752_v49 = vpop.f32.mrb[8].mxu1 }
 0x1cc   :  { %v788_v50 = vadd.f32 %v2752_v49, %v3451_v18  ;;  %v779_v51 = vpop.f32.mrb[9].mxu1 }
 0x1cd   :  { %v780_v52 = vadd.f32 %v3451_v18, %v779_v51  ;;  %v2753_v53 = vpop.f32.mrb[10].mxu1  ;;  %2818 = vmatprep.mubr.msk.bf16.mxu0 %vm1137_vm1, %v1068_v48 }
 0x1ce   :  { %v791_v54 = vadd.f32 %v2753_v53, %v3451_v18  ;;  %v782_v55 = vpop.f32.mrb[11].mxu1  ;;  %2819 = vmatmul.mubr.msk.bf16.gmra.mrb[68].mxu0 %vm1137_vm1, %v1069_v47  ;;  %v1012_v57 = vmax.f32 %v788_v50, 0.0 }
 0x1cf   :  { %v783_v56 = vadd.f32 %v3451_v18, %v782_v55  ;;  %v1010_v59 = vmax.f32 %v780_v52, 0.0 }
 0x1d0   :  { %v1013_v58 = vmax.f32 %v791_v54, 0.0 }
 0x1d1   :  { %v1011_v60 = vmax.f32 %v783_v56, 0.0 }
 0x1d2   :  { %v1071_v61 = vpack.c.bf16 %v1013_v58, %v1012_v57 }
 0x1d3   :  { %v1070_v62 = vpack.c.bf16 %v1011_v60, %v1010_v59  ;;  %v2756_v63 = vpop.f32.mrb[12].mxu1 }
 0x1d4   :  { %v804_v0 = vadd.f32 %v2756_v63, %v3451_v18  ;;  %v795_v1 = vpop.f32.mrb[13].mxu1 }
 0x1d5   :  { %v796_v2 = vadd.f32 %v3451_v18, %v795_v1  ;;  %v2757_v3 = vpop.f32.mrb[14].mxu1  ;;  %2822 = vmatprep.mubr.msk.bf16.mxu0 %vm1137_vm1, %v1070_v62 }
 0x1d6   :  { %v807_v4 = vadd.f32 %v2757_v3, %v3451_v18  ;;  %v798_v5 = vpop.f32.mrb[15].mxu1  ;;  %2823 = vmatmul.mubr.msk.bf16.gmra.mrb[72].mxu0 %vm1137_vm1, %v1071_v61  ;;  %v1016_v7 = vmax.f32 %v804_v0, 0.0 }
 0x1d7   :  { %v799_v6 = vadd.f32 %v3451_v18, %v798_v5  ;;  %v1014_v9 = vmax.f32 %v796_v2, 0.0 }
 0x1d8   :  { %v1017_v8 = vmax.f32 %v807_v4, 0.0 }
 0x1d9   :  { %v1015_v10 = vmax.f32 %v799_v6, 0.0 }
 0x1da   :  { %v1073_v11 = vpack.c.bf16 %v1017_v8, %v1016_v7 }
 0x1db   :  { %v1072_v12 = vpack.c.bf16 %v1015_v10, %v1014_v9  ;;  %v2760_v13 = vpop.f32.mrb[16].mxu1 }
 0x1dc   :  { %v820_v14 = vadd.f32 %v2760_v13, %v3451_v18  ;;  %v811_v15 = vpop.f32.mrb[17].mxu1 }
 0x1dd   :  { %v812_v16 = vadd.f32 %v3451_v18, %v811_v15  ;;  %v2761_v17 = vpop.f32.mrb[18].mxu1  ;;  %2826 = vmatprep.mubr.msk.bf16.mxu0 %vm1137_vm1, %v1072_v12 }
 0x1de   :  { %v823_v19 = vadd.f32 %v2761_v17, %v3451_v18  ;;  %v814_v20 = vpop.f32.mrb[19].mxu1  ;;  %2827 = vmatmul.mubr.msk.bf16.gmra.mrb[76].mxu0 %vm1137_vm1, %v1073_v11  ;;  %v1020_v22 = vmax.f32 %v820_v14, 0.0 }
 0x1df   :  { %v815_v21 = vadd.f32 %v3451_v18, %v814_v20  ;;  %v1018_v42 = vmax.f32 %v812_v16, 0.0 }
 0x1e0   :  { %v1021_v23 = vmax.f32 %v823_v19, 0.0 }
 0x1e1   :  { %v1019_v24 = vmax.f32 %v815_v21, 0.0 }
 0x1e2   :  { %v1075_v25 = vpack.c.bf16 %v1021_v23, %v1020_v22 }
 0x1e3   :  { %v1074_v26 = vpack.c.bf16 %v1019_v24, %v1018_v42  ;;  %v2764_v27 = vpop.f32.mrb[20].mxu1 }
 0x1e4   :  { %v836_v28 = vadd.f32 %v2764_v27, %v3451_v18  ;;  %v827_v29 = vpop.f32.mrb[21].mxu1 }
 0x1e5   :  { %v828_v30 = vadd.f32 %v3451_v18, %v827_v29  ;;  %v2765_v31 = vpop.f32.mrb[22].mxu1  ;;  %2830 = vmatprep.mubr.msk.bf16.mxu0 %vm1137_vm1, %v1074_v26 }
 0x1e6   :  { %v839_v32 = vadd.f32 %v2765_v31, %v3451_v18  ;;  %v830_v33 = vpop.f32.mrb[23].mxu1  ;;  %2831 = vmatmul.mubr.msk.bf16.gmra.mrb[80].mxu0 %vm1137_vm1, %v1075_v25  ;;  %v1024_v35 = vmax.f32 %v836_v28, 0.0 }
 0x1e7   :  { %v831_v34 = vadd.f32 %v3451_v18, %v830_v33  ;;  %v1022_v37 = vmax.f32 %v828_v30, 0.0 }
 0x1e8   :  { %v1025_v36 = vmax.f32 %v839_v32, 0.0 }
 0x1e9   :  { %v1023_v38 = vmax.f32 %v831_v34, 0.0 }
 0x1ea   :  { %v1077_v39 = vpack.c.bf16 %v1025_v36, %v1024_v35 }
 0x1eb   :  { %v1076_v40 = vpack.c.bf16 %v1023_v38, %v1022_v37  ;;  %v2768_v41 = vpop.f32.mrb[24].mxu1 }
 0x1ec   :  { %v852_v43 = vadd.f32 %v2768_v41, %v3451_v18  ;;  %v843_v44 = vpop.f32.mrb[25].mxu1 }
 0x1ed   :  { %v844_v45 = vadd.f32 %v3451_v18, %v843_v44  ;;  %v2769_v46 = vpop.f32.mrb[26].mxu1  ;;  %2834 = vmatprep.mubr.msk.bf16.mxu0 %vm1137_vm1, %v1076_v40 }
 0x1ee   :  { %v855_v47 = vadd.f32 %v2769_v46, %v3451_v18  ;;  %v846_v48 = vpop.f32.mrb[27].mxu1  ;;  %2835 = vmatmul.mubr.msk.bf16.gmra.mrb[84].mxu0 %vm1137_vm1, %v1077_v39  ;;  %v1028_v50 = vmax.f32 %v852_v43, 0.0 }
 0x1ef   :  { %v847_v49 = vadd.f32 %v3451_v18, %v846_v48  ;;  %v1026_v52 = vmax.f32 %v844_v45, 0.0 }
 0x1f0   :  { %v1029_v51 = vmax.f32 %v855_v47, 0.0 }
 0x1f1   :  { %v1027_v53 = vmax.f32 %v847_v49, 0.0 }
 0x1f2   :  { %v1079_v54 = vpack.c.bf16 %v1029_v51, %v1028_v50 }
 0x1f3   :  { %v1078_v55 = vpack.c.bf16 %v1027_v53, %v1026_v52  ;;  %v2772_v56 = vpop.f32.mrb[28].mxu1 }
 0x1f4   :  { %v868_v57 = vadd.f32 %v2772_v56, %v3451_v18  ;;  %v859_v58 = vpop.f32.mrb[29].mxu1 }
 0x1f5   :  { %v860_v59 = vadd.f32 %v3451_v18, %v859_v58  ;;  %v2773_v60 = vpop.f32.mrb[30].mxu1  ;;  %2838 = vmatprep.mubr.msk.bf16.mxu0 %vm1137_vm1, %v1078_v55 }
 0x1f6   :  { %v871_v61 = vadd.f32 %v2773_v60, %v3451_v18  ;;  %v862_v62 = vpop.f32.mrb[31].mxu1  ;;  %2839 = vmatmul.mubr.msk.bf16.gmra.mrb[88].mxu0 %vm1137_vm1, %v1079_v54  ;;  %v1032_v0 = vmax.f32 %v868_v57, 0.0 }
 0x1f7   :  { %v863_v63 = vadd.f32 %v3451_v18, %v862_v62  ;;  %v1030_v2 = vmax.f32 %v860_v59, 0.0  ;;  %v3033_v62 = vld [vmem:[%s3800_s7 + $0x10] sm:$0xff]  }
 0x1f8   :  { %v1033_v1 = vmax.f32 %v871_v61, 0.0  ;;  %2882 = vmatprep.subr.bf16.mxu1 %v3033_v62 }
 0x1f9   :  { %v1031_v3 = vmax.f32 %v863_v63, 0.0  ;;  %2883 = vmatpush3.bf16.msra.mxu1 %v3033_v62 }
 0x1fa   :  { %v1081_v4 = vpack.c.bf16 %v1033_v1, %v1032_v0 }
 0x1fb   :  { %v1080_v5 = vpack.c.bf16 %v1031_v3, %v1030_v2  ;;  %v2776_v6 = vpop.f32.mrb[32].mxu1 }
 0x1fc   :  { %v884_v7 = vadd.f32 %v2776_v6, %v3451_v18  ;;  %v875_v8 = vpop.f32.mrb[33].mxu1 }
 0x1fd   :  { %v876_v9 = vadd.f32 %v3451_v18, %v875_v8  ;;  %v2777_v10 = vpop.f32.mrb[34].mxu1  ;;  %2842 = vmatprep.mubr.msk.bf16.mxu0 %vm1137_vm1, %v1080_v5 }
 0x1fe   :  { %v887_v11 = vadd.f32 %v2777_v10, %v3451_v18  ;;  %v878_v12 = vpop.f32.mrb[35].mxu1  ;;  %2843 = vmatmul.mubr.msk.bf16.gmra.mrb[92].mxu0 %vm1137_vm1, %v1081_v4  ;;  %v1036_v14 = vmax.f32 %v884_v7, 0.0  ;;  %v3034_v7 = vld [vmem:[%s3800_s7 + $0x18] sm:$0xff]  }
 0x1ff   :  { %v879_v13 = vadd.f32 %v3451_v18, %v878_v12  ;;  %v1034_v16 = vmax.f32 %v876_v9, 0.0  ;;  %2884 = vmatprep.subr.bf16.mxu1 %v3034_v7 }
 0x200   :  { %v1037_v15 = vmax.f32 %v887_v11, 0.0  ;;  %2885 = vmatpush3.bf16.msra.mxu1 %v3034_v7 }
 0x201   :  { %v1035_v17 = vmax.f32 %v879_v13, 0.0 }
 0x202   :  { %v1083_v19 = vpack.c.bf16 %v1037_v15, %v1036_v14 }
 0x203   :  { %v1082_v20 = vpack.c.bf16 %v1035_v17, %v1034_v16  ;;  %v2780_v21 = vpop.f32.mrb[36].mxu1 }
 0x204   :  { %v900_v22 = vadd.f32 %v2780_v21, %v3451_v18  ;;  %v891_v23 = vpop.f32.mrb[37].mxu1 }
 0x205   :  { %v892_v42 = vadd.f32 %v3451_v18, %v891_v23  ;;  %v2781_v24 = vpop.f32.mrb[38].mxu1  ;;  %2846 = vmatprep.mubr.msk.bf16.mxu0 %vm1137_vm1, %v1082_v20 }
 0x206   :  { %v903_v25 = vadd.f32 %v2781_v24, %v3451_v18  ;;  %v894_v26 = vpop.f32.mrb[39].mxu1  ;;  %2847 = vmatmul.mubr.msk.bf16.gmra.mrb[96].mxu0 %vm1137_vm1, %v1083_v19  ;;  %v1040_v28 = vmax.f32 %v900_v22, 0.0 }
 0x207   :  { %v895_v27 = vadd.f32 %v3451_v18, %v894_v26  ;;  %v1038_v30 = vmax.f32 %v892_v42, 0.0 }
 0x208   :  { %v1041_v29 = vmax.f32 %v903_v25, 0.0 }
 0x209   :  { %v1039_v31 = vmax.f32 %v895_v27, 0.0 }
 0x20a   :  { %v1085_v32 = vpack.c.bf16 %v1041_v29, %v1040_v28 }
 0x20b   :  { %v1084_v33 = vpack.c.bf16 %v1039_v31, %v1038_v30  ;;  %v2784_v34 = vpop.f32.mrb[40].mxu1 }
 0x20c   :  { %v916_v35 = vadd.f32 %v2784_v34, %v3451_v18  ;;  %v907_v36 = vpop.f32.mrb[41].mxu1 }
 0x20d   :  { %v908_v37 = vadd.f32 %v3451_v18, %v907_v36  ;;  %v2785_v38 = vpop.f32.mrb[42].mxu1  ;;  %2850 = vmatprep.mubr.msk.bf16.mxu0 %vm1137_vm1, %v1084_v33 }
 0x20e   :  { %v919_v39 = vadd.f32 %v2785_v38, %v3451_v18  ;;  %v910_v40 = vpop.f32.mrb[43].mxu1  ;;  %2851 = vmatmul.mubr.msk.bf16.gmra.mrb[100].mxu0 %vm1137_vm1, %v1085_v32  ;;  %v1044_v43 = vmax.f32 %v916_v35, 0.0 }
 0x20f   :  { %v911_v41 = vadd.f32 %v3451_v18, %v910_v40  ;;  %v1042_v45 = vmax.f32 %v908_v37, 0.0 }
 0x210   :  { %v1045_v44 = vmax.f32 %v919_v39, 0.0 }
 0x211   :  { %v1043_v46 = vmax.f32 %v911_v41, 0.0 }
 0x212   :  { %v1087_v47 = vpack.c.bf16 %v1045_v44, %v1044_v43 }
 0x213   :  { %v1086_v48 = vpack.c.bf16 %v1043_v46, %v1042_v45  ;;  %v2788_v49 = vpop.f32.mrb[44].mxu1 }
 0x214   :  { %v932_v50 = vadd.f32 %v2788_v49, %v3451_v18  ;;  %v923_v51 = vpop.f32.mrb[45].mxu1 }
 0x215   :  { %v924_v52 = vadd.f32 %v3451_v18, %v923_v51  ;;  %v2789_v53 = vpop.f32.mrb[46].mxu1  ;;  %2854 = vmatprep.mubr.msk.bf16.mxu0 %vm1137_vm1, %v1086_v48 }
 0x216   :  { %v935_v54 = vadd.f32 %v2789_v53, %v3451_v18  ;;  %v926_v55 = vpop.f32.mrb[47].mxu1  ;;  %2855 = vmatmul.mubr.msk.bf16.gmra.mrb[104].mxu0 %vm1137_vm1, %v1087_v47  ;;  %v1048_v57 = vmax.f32 %v932_v50, 0.0 }
 0x217   :  { %v927_v56 = vadd.f32 %v3451_v18, %v926_v55  ;;  %v1046_v59 = vmax.f32 %v924_v52, 0.0 }
 0x218   :  { %v1049_v58 = vmax.f32 %v935_v54, 0.0 }
 0x219   :  { %v1047_v60 = vmax.f32 %v927_v56, 0.0 }
 0x21a   :  { %v1089_v61 = vpack.c.bf16 %v1049_v58, %v1048_v57  ;;  %v3564_v58 = vld [vmem:[%s3801_s6] ss:$0 sm:$0xff] }
 0x21b   :  { %v1088_v63 = vpack.c.bf16 %v1047_v60, %v1046_v59  ;;  %v2792_v0 = vpop.f32.mrb[48].mxu1 }
 0x21c   :  { %v948_v1 = vadd.f32 %v2792_v0, %v3451_v18  ;;  %v939_v2 = vpop.f32.mrb[49].mxu1 }
 0x21d   :  { %v940_v3 = vadd.f32 %v3451_v18, %v939_v2  ;;  %v2793_v4 = vpop.f32.mrb[50].mxu1  ;;  %2858 = vmatprep.mubr.msk.bf16.mxu0 %vm1137_vm1, %v1088_v63 }
 0x21e   :  { %v951_v5 = vadd.f32 %v2793_v4, %v3451_v18  ;;  %v942_v6 = vpop.f32.mrb[51].mxu1  ;;  %2859 = vmatmul.mubr.msk.bf16.gmra.mrb[108].mxu0 %vm1137_vm1, %v1089_v61  ;;  %v1052_v9 = vmax.f32 %v948_v1, 0.0 }
 0x21f   :  { %v943_v8 = vadd.f32 %v3451_v18, %v942_v6  ;;  %v1050_v11 = vmax.f32 %v940_v3, 0.0 }
 0x220   :  { %v1053_v10 = vmax.f32 %v951_v5, 0.0 }
 0x221   :  { %v1051_v12 = vmax.f32 %v943_v8, 0.0 }
 0x222   :  { %v1091_v13 = vpack.c.bf16 %v1053_v10, %v1052_v9 }
 0x223   :  { %v1090_v14 = vpack.c.bf16 %v1051_v12, %v1050_v11  ;;  %v2796_v15 = vpop.f32.mrb[52].mxu1 }
 0x224   :  { %v964_v16 = vadd.f32 %v2796_v15, %v3451_v18  ;;  %v955_v17 = vpop.f32.mrb[53].mxu1 }
 0x225   :  { %2862 = vmatprep.mubr.msk.bf16.mxu0 %vm1137_vm1, %v1090_v14  ;;  %v956_v19 = vadd.f32 %v3451_v18, %v955_v17  ;;  %v2797_v20 = vpop.f32.mrb[54].mxu1 }
 0x226   :  { %2863 = vmatmul.mubr.msk.bf16.gmra.mrb[112].mxu0 %vm1137_vm1, %v1091_v13  ;;  %v1056_v21 = vmax.f32 %v964_v16, 0.0  ;;  %v967_v22 = vadd.f32 %v2797_v20, %v3451_v18  ;;  %v958_v23 = vpop.f32.mrb[55].mxu1 }
 0x227   :  { %v1054_v42 = vmax.f32 %v956_v19, 0.0  ;;  %v959_v24 = vadd.f32 %v3451_v18, %v958_v23 }
 0x228   :  { %v1057_v25 = vmax.f32 %v967_v22, 0.0 }
 0x229   :  { %v1055_v26 = vmax.f32 %v959_v24, 0.0 }
 0x22a   :  { %v1093_v27 = vpack.c.bf16 %v1057_v25, %v1056_v21 }
 0x22b   :  { %v1092_v28 = vpack.c.bf16 %v1055_v26, %v1054_v42  ;;  %v2800_v29 = vpop.f32.mrb[56].mxu1 }
 0x22c   :  { %v980_v30 = vadd.f32 %v2800_v29, %v3451_v18  ;;  %v971_v31 = vpop.f32.mrb[57].mxu1 }
 0x22d   :  { %2866 = vmatprep.mubr.msk.bf16.mxu0 %vm1137_vm1, %v1092_v28  ;;  %v972_v32 = vadd.f32 %v3451_v18, %v971_v31  ;;  %v2801_v33 = vpop.f32.mrb[58].mxu1 }
 0x22e   :  { %2867 = vmatmul.mubr.msk.bf16.gmra.mrb[116].mxu0 %vm1137_vm1, %v1093_v27  ;;  %v1060_v34 = vmax.f32 %v980_v30, 0.0  ;;  %v983_v35 = vadd.f32 %v2801_v33, %v3451_v18  ;;  %v974_v36 = vpop.f32.mrb[59].mxu1 }
 0x22f   :  { %v1058_v37 = vmax.f32 %v972_v32, 0.0  ;;  %v975_v38 = vadd.f32 %v3451_v18, %v974_v36 }
 0x230   :  { %v1061_v39 = vmax.f32 %v983_v35, 0.0 }
 0x231   :  { %v1059_v40 = vmax.f32 %v975_v38, 0.0 }
 0x232   :  { %v1095_v41 = vpack.c.bf16 %v1061_v39, %v1060_v34 }
 0x233   :  { %v1094_v43 = vpack.c.bf16 %v1059_v40, %v1058_v37  ;;  %v2804_v44 = vpop.f32.mrb[60].mxu1 }
 0x234   :  { %v996_v45 = vadd.f32 %v2804_v44, %v3451_v18  ;;  %v987_v46 = vpop.f32.mrb[61].mxu1 }
 0x235   :  { %2870 = vmatprep.mubr.msk.bf16.mxu0 %vm1137_vm1, %v1094_v43  ;;  %v988_v47 = vadd.f32 %v3451_v18, %v987_v46  ;;  %v2805_v48 = vpop.f32.mrb[62].mxu1 }
 0x236   :  { %2871 = vmatmul.mubr.msk.bf16.gmra.mrb[120].mxu0 %vm1137_vm1, %v1095_v41  ;;  %v1064_v49 = vmax.f32 %v996_v45, 0.0  ;;  %v999_v50 = vadd.f32 %v2805_v48, %v3451_v18  ;;  %v990_v51 = vpop.f32.mrb[63].mxu1 }
 0x237   :  { %v1062_v52 = vmax.f32 %v988_v47, 0.0  ;;  %v991_v53 = vadd.f32 %v3451_v18, %v990_v51 }
 0x238   :  { %v1065_v54 = vmax.f32 %v999_v50, 0.0 }
 0x239   :  { %v1063_v55 = vmax.f32 %v991_v53, 0.0 }
 0x23a   :  { %v1097_v56 = vpack.c.bf16 %v1065_v54, %v1064_v49 }
 0x23b   :  { %v1096_v57 = vpack.c.bf16 %v1063_v55, %v1062_v52 }
 0x23d   :  { %2874 = vmatprep.mubr.msk.bf16.mxu0 %vm1137_vm1, %v1096_v57 }
 0x23e   :  { %2875 = vmatmul.mubr.msk.bf16.gmra.mrb[124].mxu0 %vm1137_vm1, %v1097_v56 }
 0x299   :  { %v2816_v59 = vpop.f32.mrb[64].mxu0 }
 0x29a   :  { %v1277_v60 = vadd.f32 %v2816_v59, %v3564_v58  ;;  %v1268_v61 = vpop.f32.mrb[65].mxu0 }
 0x29b   :  { %v1269_v62 = vadd.f32 %v3564_v58, %v1268_v61  ;;  %v2817_v18 = vpop.f32.mrb[66].mxu0 }
 0x29c   :  { %v1280_v63 = vadd.f32 %v2817_v18, %v3564_v58  ;;  %v1271_v0 = vpop.f32.mrb[67].mxu0  ;;  %v1525_v2 = vmax.f32 %v1277_v60, 0.0 }
 0x29d   :  { %v1272_v1 = vadd.f32 %v3564_v58, %v1271_v0  ;;  %v1523_v4 = vmax.f32 %v1269_v62, 0.0 }
 0x29e   :  { %v1526_v3 = vmax.f32 %v1280_v63, 0.0 }
 0x29f   :  { %v1524_v5 = vmax.f32 %v1272_v1, 0.0 }
 0x2a0   :  { %v1588_v6 = vpack.c.bf16 %v1526_v3, %v1525_v2 }
 0x2a1   :  { %v1587_v7 = vpack.c.bf16 %v1524_v5, %v1523_v4  ;;  %v2820_v8 = vpop.f32.mrb[68].mxu0 }
 0x2a2   :  { %v1293_v9 = vadd.f32 %v2820_v8, %v3564_v58  ;;  %v1284_v10 = vpop.f32.mrb[69].mxu0 }
 0x2a3   :  { %v1285_v11 = vadd.f32 %v3564_v58, %v1284_v10  ;;  %v2821_v12 = vpop.f32.mrb[70].mxu0  ;;  %2886 = vmatprep.mubr.msk.bf16.mxu1 %vm1137_vm1, %v1587_v7 }
 0x2a4   :  { %v1296_v13 = vadd.f32 %v2821_v12, %v3564_v58  ;;  %v1287_v14 = vpop.f32.mrb[71].mxu0  ;;  %2887 = vmatmul.mubr.msk.bf16.vlgmr.msra.gmra.mrb[64].mxu1 %vm1137_vm1, %v1588_v6  ;;  %v1529_v16 = vmax.f32 %v1293_v9, 0.0 }
 0x2a5   :  { %v1288_v15 = vadd.f32 %v3564_v58, %v1287_v14  ;;  %v1527_v19 = vmax.f32 %v1285_v11, 0.0 }
 0x2a6   :  { %v1530_v17 = vmax.f32 %v1296_v13, 0.0 }
 0x2a7   :  { %v1528_v20 = vmax.f32 %v1288_v15, 0.0 }
 0x2a8   :  { %v1590_v21 = vpack.c.bf16 %v1530_v17, %v1529_v16 }
 0x2a9   :  { %v1589_v22 = vpack.c.bf16 %v1528_v20, %v1527_v19  ;;  %v2824_v23 = vpop.f32.mrb[72].mxu0 }
 0x2aa   :  { %v1309_v42 = vadd.f32 %v2824_v23, %v3564_v58  ;;  %v1300_v24 = vpop.f32.mrb[73].mxu0 }
 0x2ab   :  { %v1301_v25 = vadd.f32 %v3564_v58, %v1300_v24  ;;  %v2825_v26 = vpop.f32.mrb[74].mxu0  ;;  %2890 = vmatprep.mubr.msk.bf16.mxu1 %vm1137_vm1, %v1589_v22 }
 0x2ac   :  { %v1312_v27 = vadd.f32 %v2825_v26, %v3564_v58  ;;  %v1303_v28 = vpop.f32.mrb[75].mxu0  ;;  %2891 = vmatmul.mubr.msk.bf16.gmra.mrb[68].mxu1 %vm1137_vm1, %v1590_v21  ;;  %v1533_v30 = vmax.f32 %v1309_v42, 0.0 }
 0x2ad   :  { %v1304_v29 = vadd.f32 %v3564_v58, %v1303_v28  ;;  %v1531_v32 = vmax.f32 %v1301_v25, 0.0 }
 0x2ae   :  { %v1534_v31 = vmax.f32 %v1312_v27, 0.0 }
 0x2af   :  { %v1532_v33 = vmax.f32 %v1304_v29, 0.0 }
 0x2b0   :  { %v1592_v34 = vpack.c.bf16 %v1534_v31, %v1533_v30 }
 0x2b1   :  { %v1591_v35 = vpack.c.bf16 %v1532_v33, %v1531_v32  ;;  %v2828_v36 = vpop.f32.mrb[76].mxu0 }
 0x2b2   :  { %v1325_v37 = vadd.f32 %v2828_v36, %v3564_v58  ;;  %v1316_v38 = vpop.f32.mrb[77].mxu0 }
 0x2b3   :  { %v1317_v39 = vadd.f32 %v3564_v58, %v1316_v38  ;;  %v2829_v40 = vpop.f32.mrb[78].mxu0  ;;  %2894 = vmatprep.mubr.msk.bf16.mxu1 %vm1137_vm1, %v1591_v35 }
 0x2b4   :  { %v1328_v41 = vadd.f32 %v2829_v40, %v3564_v58  ;;  %v1319_v43 = vpop.f32.mrb[79].mxu0  ;;  %2895 = vmatmul.mubr.msk.bf16.gmra.mrb[72].mxu1 %vm1137_vm1, %v1592_v34  ;;  %v1537_v45 = vmax.f32 %v1325_v37, 0.0 }
 0x2b5   :  { %v1320_v44 = vadd.f32 %v3564_v58, %v1319_v43  ;;  %v1535_v47 = vmax.f32 %v1317_v39, 0.0 }
 0x2b6   :  { %v1538_v46 = vmax.f32 %v1328_v41, 0.0 }
 0x2b7   :  { %v1536_v48 = vmax.f32 %v1320_v44, 0.0 }
 0x2b8   :  { %v1594_v49 = vpack.c.bf16 %v1538_v46, %v1537_v45 }
 0x2b9   :  { %v1593_v50 = vpack.c.bf16 %v1536_v48, %v1535_v47  ;;  %v2832_v51 = vpop.f32.mrb[80].mxu0 }
 0x2ba   :  { %v1341_v52 = vadd.f32 %v2832_v51, %v3564_v58  ;;  %v1332_v53 = vpop.f32.mrb[81].mxu0 }
 0x2bb   :  { %v1333_v54 = vadd.f32 %v3564_v58, %v1332_v53  ;;  %v2833_v55 = vpop.f32.mrb[82].mxu0  ;;  %2898 = vmatprep.mubr.msk.bf16.mxu1 %vm1137_vm1, %v1593_v50 }
 0x2bc   :  { %v1344_v56 = vadd.f32 %v2833_v55, %v3564_v58  ;;  %v1335_v57 = vpop.f32.mrb[83].mxu0  ;;  %2899 = vmatmul.mubr.msk.bf16.gmra.mrb[76].mxu1 %vm1137_vm1, %v1594_v49  ;;  %v1541_v60 = vmax.f32 %v1341_v52, 0.0 }
 0x2bd   :  { %v1336_v59 = vadd.f32 %v3564_v58, %v1335_v57  ;;  %v1539_v62 = vmax.f32 %v1333_v54, 0.0 }
 0x2be   :  { %v1542_v61 = vmax.f32 %v1344_v56, 0.0 }
 0x2bf   :  { %v1540_v18 = vmax.f32 %v1336_v59, 0.0 }
 0x2c0   :  { %v1596_v63 = vpack.c.bf16 %v1542_v61, %v1541_v60 }
 0x2c1   :  { %v1595_v0 = vpack.c.bf16 %v1540_v18, %v1539_v62  ;;  %v2836_v1 = vpop.f32.mrb[84].mxu0 }
 0x2c2   :  { %v1357_v2 = vadd.f32 %v2836_v1, %v3564_v58  ;;  %v1348_v3 = vpop.f32.mrb[85].mxu0 }
 0x2c3   :  { %v1349_v4 = vadd.f32 %v3564_v58, %v1348_v3  ;;  %v2837_v5 = vpop.f32.mrb[86].mxu0  ;;  %2902 = vmatprep.mubr.msk.bf16.mxu1 %vm1137_vm1, %v1595_v0 }
 0x2c4   :  { %v1360_v6 = vadd.f32 %v2837_v5, %v3564_v58  ;;  %v1351_v7 = vpop.f32.mrb[87].mxu0  ;;  %2903 = vmatmul.mubr.msk.bf16.gmra.mrb[80].mxu1 %vm1137_vm1, %v1596_v63  ;;  %v1545_v9 = vmax.f32 %v1357_v2, 0.0 }
 0x2c5   :  { %v1352_v8 = vadd.f32 %v3564_v58, %v1351_v7  ;;  %v1543_v11 = vmax.f32 %v1349_v4, 0.0 }
 0x2c6   :  { %v1546_v10 = vmax.f32 %v1360_v6, 0.0 }
 0x2c7   :  { %v1544_v12 = vmax.f32 %v1352_v8, 0.0 }
 0x2c8   :  { %v1598_v13 = vpack.c.bf16 %v1546_v10, %v1545_v9 }
 0x2c9   :  { %v1597_v14 = vpack.c.bf16 %v1544_v12, %v1543_v11  ;;  %v2840_v15 = vpop.f32.mrb[88].mxu0 }
 0x2ca   :  { %v1373_v16 = vadd.f32 %v2840_v15, %v3564_v58  ;;  %v1364_v17 = vpop.f32.mrb[89].mxu0 }
 0x2cb   :  { %v1365_v19 = vadd.f32 %v3564_v58, %v1364_v17  ;;  %v2841_v20 = vpop.f32.mrb[90].mxu0  ;;  %2906 = vmatprep.mubr.msk.bf16.mxu1 %vm1137_vm1, %v1597_v14 }
 0x2cc   :  { %v1376_v21 = vadd.f32 %v2841_v20, %v3564_v58  ;;  %v1367_v22 = vpop.f32.mrb[91].mxu0  ;;  %2907 = vmatmul.mubr.msk.bf16.gmra.mrb[84].mxu1 %vm1137_vm1, %v1598_v13  ;;  %v1549_v42 = vmax.f32 %v1373_v16, 0.0 }
 0x2cd   :  { %v1368_v23 = vadd.f32 %v3564_v58, %v1367_v22  ;;  %v1547_v25 = vmax.f32 %v1365_v19, 0.0 }
 0x2ce   :  { %v1550_v24 = vmax.f32 %v1376_v21, 0.0 }
 0x2cf   :  { %v1548_v26 = vmax.f32 %v1368_v23, 0.0 }
 0x2d0   :  { %v1600_v27 = vpack.c.bf16 %v1550_v24, %v1549_v42 }
 0x2d1   :  { %v1599_v28 = vpack.c.bf16 %v1548_v26, %v1547_v25  ;;  %v2844_v29 = vpop.f32.mrb[92].mxu0 }
 0x2d2   :  { %v1389_v30 = vadd.f32 %v2844_v29, %v3564_v58  ;;  %v1380_v31 = vpop.f32.mrb[93].mxu0 }
 0x2d3   :  { %v1381_v32 = vadd.f32 %v3564_v58, %v1380_v31  ;;  %v2845_v33 = vpop.f32.mrb[94].mxu0  ;;  %2910 = vmatprep.mubr.msk.bf16.mxu1 %vm1137_vm1, %v1599_v28 }
 0x2d4   :  { %v1392_v34 = vadd.f32 %v2845_v33, %v3564_v58  ;;  %v1383_v35 = vpop.f32.mrb[95].mxu0  ;;  %2911 = vmatmul.mubr.msk.bf16.gmra.mrb[88].mxu1 %vm1137_vm1, %v1600_v27  ;;  %v1553_v37 = vmax.f32 %v1389_v30, 0.0 }
 0x2d5   :  { %v1384_v36 = vadd.f32 %v3564_v58, %v1383_v35  ;;  %v1551_v39 = vmax.f32 %v1381_v32, 0.0 }
 0x2d6   :  { %v1554_v38 = vmax.f32 %v1392_v34, 0.0 }
 0x2d7   :  { %v1552_v40 = vmax.f32 %v1384_v36, 0.0 }
 0x2d8   :  { %v1602_v41 = vpack.c.bf16 %v1554_v38, %v1553_v37 }
 0x2d9   :  { %v1601_v43 = vpack.c.bf16 %v1552_v40, %v1551_v39  ;;  %v2848_v44 = vpop.f32.mrb[96].mxu0 }
 0x2da   :  { %v1405_v45 = vadd.f32 %v2848_v44, %v3564_v58  ;;  %v1396_v46 = vpop.f32.mrb[97].mxu0 }
 0x2db   :  { %v1397_v47 = vadd.f32 %v3564_v58, %v1396_v46  ;;  %v2849_v48 = vpop.f32.mrb[98].mxu0  ;;  %2914 = vmatprep.mubr.msk.bf16.mxu1 %vm1137_vm1, %v1601_v43 }
 0x2dc   :  { %v1408_v49 = vadd.f32 %v2849_v48, %v3564_v58  ;;  %v1399_v50 = vpop.f32.mrb[99].mxu0  ;;  %2915 = vmatmul.mubr.msk.bf16.gmra.mrb[92].mxu1 %vm1137_vm1, %v1602_v41  ;;  %v1557_v52 = vmax.f32 %v1405_v45, 0.0 }
 0x2dd   :  { %v1400_v51 = vadd.f32 %v3564_v58, %v1399_v50  ;;  %v1555_v54 = vmax.f32 %v1397_v47, 0.0 }
 0x2de   :  { %v1558_v53 = vmax.f32 %v1408_v49, 0.0 }
 0x2df   :  { %v1556_v55 = vmax.f32 %v1400_v51, 0.0 }
 0x2e0   :  { %v1604_v56 = vpack.c.bf16 %v1558_v53, %v1557_v52 }
 0x2e1   :  { %v1603_v57 = vpack.c.bf16 %v1556_v55, %v1555_v54  ;;  %v2852_v59 = vpop.f32.mrb[100].mxu0 }
 0x2e2   :  { %v1421_v60 = vadd.f32 %v2852_v59, %v3564_v58  ;;  %v1412_v61 = vpop.f32.mrb[101].mxu0 }
 0x2e3   :  { %v1413_v62 = vadd.f32 %v3564_v58, %v1412_v61  ;;  %v2853_v18 = vpop.f32.mrb[102].mxu0  ;;  %2918 = vmatprep.mubr.msk.bf16.mxu1 %vm1137_vm1, %v1603_v57 }
 0x2e4   :  { %v1424_v63 = vadd.f32 %v2853_v18, %v3564_v58  ;;  %v1415_v0 = vpop.f32.mrb[103].mxu0  ;;  %2919 = vmatmul.mubr.msk.bf16.gmra.mrb[96].mxu1 %vm1137_vm1, %v1604_v56  ;;  %v1561_v2 = vmax.f32 %v1421_v60, 0.0 }
 0x2e5   :  { %v1416_v1 = vadd.f32 %v3564_v58, %v1415_v0  ;;  %v1559_v4 = vmax.f32 %v1413_v62, 0.0 }
 0x2e6   :  { %v1562_v3 = vmax.f32 %v1424_v63, 0.0 }
 0x2e7   :  { %v1560_v5 = vmax.f32 %v1416_v1, 0.0 }
 0x2e8   :  { %v1606_v6 = vpack.c.bf16 %v1562_v3, %v1561_v2 }
 0x2e9   :  { %v1605_v7 = vpack.c.bf16 %v1560_v5, %v1559_v4  ;;  %v2856_v8 = vpop.f32.mrb[104].mxu0 }
 0x2ea   :  { %v1437_v9 = vadd.f32 %v2856_v8, %v3564_v58  ;;  %v1428_v10 = vpop.f32.mrb[105].mxu0 }
 0x2eb   :  { %v1429_v11 = vadd.f32 %v3564_v58, %v1428_v10  ;;  %v2857_v12 = vpop.f32.mrb[106].mxu0  ;;  %2922 = vmatprep.mubr.msk.bf16.mxu1 %vm1137_vm1, %v1605_v7 }
 0x2ec   :  { %v1440_v13 = vadd.f32 %v2857_v12, %v3564_v58  ;;  %v1431_v14 = vpop.f32.mrb[107].mxu0  ;;  %2923 = vmatmul.mubr.msk.bf16.gmra.mrb[100].mxu1 %vm1137_vm1, %v1606_v6  ;;  %v1565_v16 = vmax.f32 %v1437_v9, 0.0 }
 0x2ed   :  { %v1432_v15 = vadd.f32 %v3564_v58, %v1431_v14  ;;  %v1563_v19 = vmax.f32 %v1429_v11, 0.0 }
 0x2ee   :  { %v1566_v17 = vmax.f32 %v1440_v13, 0.0 }
 0x2ef   :  { %v1564_v20 = vmax.f32 %v1432_v15, 0.0 }
 0x2f0   :  { %v1608_v21 = vpack.c.bf16 %v1566_v17, %v1565_v16 }
 0x2f1   :  { %v1607_v22 = vpack.c.bf16 %v1564_v20, %v1563_v19  ;;  %v2860_v23 = vpop.f32.mrb[108].mxu0 }
 0x2f2   :  { %v1453_v42 = vadd.f32 %v2860_v23, %v3564_v58  ;;  %v1444_v24 = vpop.f32.mrb[109].mxu0 }
 0x2f3   :  { %v1445_v25 = vadd.f32 %v3564_v58, %v1444_v24  ;;  %v2861_v26 = vpop.f32.mrb[110].mxu0  ;;  %2926 = vmatprep.mubr.msk.bf16.mxu1 %vm1137_vm1, %v1607_v22 }
 0x2f4   :  { %v1456_v27 = vadd.f32 %v2861_v26, %v3564_v58  ;;  %v1447_v28 = vpop.f32.mrb[111].mxu0  ;;  %2927 = vmatmul.mubr.msk.bf16.gmra.mrb[104].mxu1 %vm1137_vm1, %v1608_v21  ;;  %v1569_v30 = vmax.f32 %v1453_v42, 0.0 }
 0x2f5   :  { %v1448_v29 = vadd.f32 %v3564_v58, %v1447_v28  ;;  %v1567_v32 = vmax.f32 %v1445_v25, 0.0 }
 0x2f6   :  { %v1570_v31 = vmax.f32 %v1456_v27, 0.0 }
 0x2f7   :  { %v1568_v33 = vmax.f32 %v1448_v29, 0.0  ;;  %v3665_v29 = vld [vmem:[%s3802_s8] ss:$0 sm:$0xff] }
 0x2f8   :  { %v1610_v34 = vpack.c.bf16 %v1570_v31, %v1569_v30 }
 0x2f9   :  { %v1609_v35 = vpack.c.bf16 %v1568_v33, %v1567_v32  ;;  %v2864_v36 = vpop.f32.mrb[112].mxu0 }
 0x2fa   :  { %v1469_v37 = vadd.f32 %v2864_v36, %v3564_v58  ;;  %v1460_v38 = vpop.f32.mrb[113].mxu0 }
 0x2fb   :  { %v1461_v39 = vadd.f32 %v3564_v58, %v1460_v38  ;;  %v2865_v40 = vpop.f32.mrb[114].mxu0  ;;  %2930 = vmatprep.mubr.msk.bf16.mxu1 %vm1137_vm1, %v1609_v35 }
 0x2fc   :  { %v1472_v41 = vadd.f32 %v2865_v40, %v3564_v58  ;;  %v1463_v43 = vpop.f32.mrb[115].mxu0  ;;  %2931 = vmatmul.mubr.msk.bf16.gmra.mrb[108].mxu1 %vm1137_vm1, %v1610_v34  ;;  %v1573_v45 = vmax.f32 %v1469_v37, 0.0 }
 0x2fd   :  { %v1464_v44 = vadd.f32 %v3564_v58, %v1463_v43  ;;  %v1571_v47 = vmax.f32 %v1461_v39, 0.0 }
 0x2fe   :  { %v1574_v46 = vmax.f32 %v1472_v41, 0.0 }
 0x2ff   :  { %v1572_v48 = vmax.f32 %v1464_v44, 0.0 }
 0x300   :  { %v1612_v49 = vpack.c.bf16 %v1574_v46, %v1573_v45 }
 0x301   :  { %v1611_v50 = vpack.c.bf16 %v1572_v48, %v1571_v47  ;;  %v2868_v51 = vpop.f32.mrb[116].mxu0 }
 0x302   :  { %v1485_v52 = vadd.f32 %v2868_v51, %v3564_v58  ;;  %v1476_v53 = vpop.f32.mrb[117].mxu0 }
 0x303   :  { %2934 = vmatprep.mubr.msk.bf16.mxu1 %vm1137_vm1, %v1611_v50  ;;  %v1477_v54 = vadd.f32 %v3564_v58, %v1476_v53  ;;  %v2869_v55 = vpop.f32.mrb[118].mxu0 }
 0x304   :  { %2935 = vmatmul.mubr.msk.bf16.gmra.mrb[112].mxu1 %vm1137_vm1, %v1612_v49  ;;  %v1488_v56 = vadd.f32 %v2869_v55, %v3564_v58  ;;  %v1479_v57 = vpop.f32.mrb[119].mxu0  ;;  %v1577_v60 = vmax.f32 %v1485_v52, 0.0 }
 0x305   :  { %v1480_v59 = vadd.f32 %v3564_v58, %v1479_v57  ;;  %v1575_v62 = vmax.f32 %v1477_v54, 0.0 }
 0x306   :  { %v1578_v61 = vmax.f32 %v1488_v56, 0.0 }
 0x307   :  { %v1576_v18 = vmax.f32 %v1480_v59, 0.0 }
 0x308   :  { %v1614_v63 = vpack.c.bf16 %v1578_v61, %v1577_v60 }
 0x309   :  { %v1613_v0 = vpack.c.bf16 %v1576_v18, %v1575_v62  ;;  %v2872_v1 = vpop.f32.mrb[120].mxu0 }
 0x30a   :  { %v1501_v2 = vadd.f32 %v2872_v1, %v3564_v58  ;;  %v1492_v3 = vpop.f32.mrb[121].mxu0 }
 0x30b   :  { %2938 = vmatprep.mubr.msk.bf16.mxu1 %vm1137_vm1, %v1613_v0  ;;  %v1493_v4 = vadd.f32 %v3564_v58, %v1492_v3  ;;  %v2873_v5 = vpop.f32.mrb[122].mxu0 }
 0x30c   :  { %2939 = vmatmul.mubr.msk.bf16.gmra.mrb[116].mxu1 %vm1137_vm1, %v1614_v63  ;;  %v1581_v6 = vmax.f32 %v1501_v2, 0.0  ;;  %v1504_v7 = vadd.f32 %v2873_v5, %v3564_v58  ;;  %v1495_v8 = vpop.f32.mrb[123].mxu0 }
 0x30d   :  { %v1579_v9 = vmax.f32 %v1493_v4, 0.0  ;;  %v1496_v10 = vadd.f32 %v3564_v58, %v1495_v8 }
 0x30e   :  { %v1582_v11 = vmax.f32 %v1504_v7, 0.0 }
 0x30f   :  { %v1580_v12 = vmax.f32 %v1496_v10, 0.0 }
 0x310   :  { %v1616_v13 = vpack.c.bf16 %v1582_v11, %v1581_v6 }
 0x311   :  { %v1615_v14 = vpack.c.bf16 %v1580_v12, %v1579_v9  ;;  %v2876_v15 = vpop.f32.mrb[124].mxu0 }
 0x312   :  { %v1517_v16 = vadd.f32 %v2876_v15, %v3564_v58  ;;  %v1508_v17 = vpop.f32.mrb[125].mxu0 }
 0x313   :  { %2942 = vmatprep.mubr.msk.bf16.mxu1 %vm1137_vm1, %v1615_v14  ;;  %v1509_v19 = vadd.f32 %v3564_v58, %v1508_v17  ;;  %v2877_v20 = vpop.f32.mrb[126].mxu0 }
 0x314   :  { %2943 = vmatmul.mubr.msk.bf16.gmra.mrb[120].mxu1 %vm1137_vm1, %v1616_v13  ;;  %v1585_v21 = vmax.f32 %v1517_v16, 0.0  ;;  %v1520_v22 = vadd.f32 %v2877_v20, %v3564_v58  ;;  %v1511_v23 = vpop.f32.mrb[127].mxu0 }
 0x315   :  { %v1583_v42 = vmax.f32 %v1509_v19, 0.0  ;;  %v1512_v24 = vadd.f32 %v3564_v58, %v1511_v23 }
 0x316   :  { %v1586_v25 = vmax.f32 %v1520_v22, 0.0 }
 0x317   :  { %v1584_v26 = vmax.f32 %v1512_v24, 0.0 }
 0x318   :  { %v1618_v27 = vpack.c.bf16 %v1586_v25, %v1585_v21 }
 0x319   :  { %v1617_v28 = vpack.c.bf16 %v1584_v26, %v1583_v42 }
 0x31b   :  { %2946 = vmatprep.mubr.msk.bf16.mxu1 %vm1137_vm1, %v1617_v28 }
 0x31c   :  { %2947 = vmatmul.mubr.msk.bf16.gmra.mrb[124].mxu1 %vm1137_vm1, %v1618_v27 }
 0x377   :  { %v2888_v30 = vpop.f32.mrb[64].mxu1 }
 0x378   :  { %v1797_v31 = vadd.f32 %v2888_v30, %v3665_v29  ;;  %v1788_v32 = vpop.f32.mrb[65].mxu1 }
 0x379   :  { %v1789_v33 = vadd.f32 %v3665_v29, %v1788_v32  ;;  %v2889_v58 = vpop.f32.mrb[66].mxu1 }
 0x37a   :  { %v1800_v34 = vadd.f32 %v2889_v58, %v3665_v29  ;;  %v1791_v35 = vpop.f32.mrb[67].mxu1  ;;  %v2045_v37 = vmax.f32 %v1797_v31, 0.0  ;;  %v3706_v31 = vld [vmem:[%s3803_s9] sm:$0xff] }
 0x37b   :  { %v1792_v36 = vadd.f32 %v3665_v29, %v1791_v35  ;;  %v2043_v39 = vmax.f32 %v1789_v33, 0.0  ;;  %2622 = vmatprep.mubr.f32.mxu0 %v3706_v31  ;;  %2656 = vmatprep.mubr.f32.mxu1 %v3706_v31 }
 0x37c   :  { %v2046_v38 = vmax.f32 %v1800_v34, 0.0 }
 0x37d   :  { %v2044_v40 = vmax.f32 %v1792_v36, 0.0 }
 0x37e   :  { %v3671_v41 = vpack.c.bf16 %v2046_v38, %v2045_v37 }
 0x37f   :  { %v3673_v43 = vpack.c.bf16 %v2044_v40, %v2043_v39  ;;  %v2892_v44 = vpop.f32.mrb[68].mxu1 }
 0x380   :  { %v1813_v45 = vadd.f32 %v2892_v44, %v3665_v29  ;;  %v1804_v46 = vpop.f32.mrb[69].mxu1 }
 0x381   :  { %v1805_v47 = vadd.f32 %v3665_v29, %v1804_v46  ;;  %v2893_v48 = vpop.f32.mrb[70].mxu1 }
 0x382   :  { %v1816_v49 = vadd.f32 %v2893_v48, %v3665_v29  ;;  %v1807_v50 = vpop.f32.mrb[71].mxu1  ;;  %v2049_v52 = vmax.f32 %v1813_v45, 0.0  ;;  %v16_v48 = vstv %s3804_s10 }
 0x383   :  { %v1808_v51 = vadd.f32 %v3665_v29, %v1807_v50  ;;  %v2047_v54 = vmax.f32 %v1805_v47, 0.0  ;;  %v3051_v47 = vmov 0   ;;  %17 = vst [vmem:[#allocation2] sm:$0x1] %v16_v48 }
 0x384   :  { %v2050_v53 = vmax.f32 %v1816_v49, 0.0  ;;  %3016 = vset.pattern.permute.xlu0 %v3051_v47 }
 0x385   :  { %v2048_v55 = vmax.f32 %v1808_v51, 0.0 }
 0x386   :  { %v3679_v56 = vpack.c.bf16 %v2050_v53, %v2049_v52 }
 0x387   :  { %v3681_v57 = vpack.c.bf16 %v2048_v55, %v2047_v54  ;;  %v2896_v59 = vpop.f32.mrb[72].mxu1 }
 0x388   :  { %v1829_v60 = vadd.f32 %v2896_v59, %v3665_v29  ;;  %v1820_v61 = vpop.f32.mrb[73].mxu1 }
 0x389   :  { %v1821_v62 = vadd.f32 %v3665_v29, %v1820_v61  ;;  %v2897_v18 = vpop.f32.mrb[74].mxu1 }
 0x38a   :  { %v1832_v63 = vadd.f32 %v2897_v18, %v3665_v29  ;;  %v1823_v0 = vpop.f32.mrb[75].mxu1  ;;  %v2053_v2 = vmax.f32 %v1829_v60, 0.0 }
 0x38b   :  { %v1824_v1 = vadd.f32 %v3665_v29, %v1823_v0  ;;  %v2051_v4 = vmax.f32 %v1821_v62, 0.0  ;;  %v2250_v0 = vld [vmem:[#allocation2] sm:$0x1] }
 0x38c   :  { %v2054_v3 = vmax.f32 %v1832_v63, 0.0  ;;  %2253 = vperm.xlu0 %3016, %v2250_v0  }
 0x38d   :  { %v2052_v5 = vmax.f32 %v1824_v1, 0.0 }
 0x38e   :  { %v3687_v6 = vpack.c.bf16 %v2054_v3, %v2053_v2 }
 0x38f   :  { %v3689_v7 = vpack.c.bf16 %v2052_v5, %v2051_v4  ;;  %v2900_v8 = vpop.f32.mrb[76].mxu1 }
 0x390   :  { %v1845_v9 = vadd.f32 %v2900_v8, %v3665_v29  ;;  %v1836_v10 = vpop.f32.mrb[77].mxu1 }
 0x391   :  { %v1837_v11 = vadd.f32 %v3665_v29, %v1836_v10  ;;  %v2901_v12 = vpop.f32.mrb[78].mxu1 }
 0x392   :  { %v1848_v13 = vadd.f32 %v2901_v12, %v3665_v29  ;;  %v1839_v14 = vpop.f32.mrb[79].mxu1  ;;  %v2057_v16 = vmax.f32 %v1845_v9, 0.0 }
 0x393   :  { %v1840_v15 = vadd.f32 %v3665_v29, %v1839_v14  ;;  %v2055_v19 = vmax.f32 %v1837_v11, 0.0 }
 0x394   :  { %v2058_v17 = vmax.f32 %v1848_v13, 0.0 }
 0x395   :  { %v2056_v20 = vmax.f32 %v1840_v15, 0.0 }
 0x396   :  { %v3695_v21 = vpack.c.bf16 %v2058_v17, %v2057_v16 }
 0x397   :  { %v3697_v22 = vpack.c.bf16 %v2056_v20, %v2055_v19  ;;  %v2904_v23 = vpop.f32.mrb[80].mxu1 }
 0x398   :  { %v1861_v42 = vadd.f32 %v2904_v23, %v3665_v29  ;;  %v1852_v24 = vpop.f32.mrb[81].mxu1 }
 0x399   :  { %v1853_v25 = vadd.f32 %v3665_v29, %v1852_v24  ;;  %v2905_v26 = vpop.f32.mrb[82].mxu1 }
 0x39a   :  { %v1864_v27 = vadd.f32 %v2905_v26, %v3665_v29  ;;  %v1855_v28 = vpop.f32.mrb[83].mxu1  ;;  %v2061_v32 = vmax.f32 %v1861_v42, 0.0 }
 0x39b   :  { %v1856_v30 = vadd.f32 %v3665_v29, %v1855_v28  ;;  %v2059_v58 = vmax.f32 %v1853_v25, 0.0 }
 0x39c   :  { %v2062_v33 = vmax.f32 %v1864_v27, 0.0 }
 0x39d   :  { %v2060_v34 = vmax.f32 %v1856_v30, 0.0 }
 0x39e   :  { %v2954_v35 = vpack.c.bf16 %v2062_v33, %v2061_v32 }
 0x39f   :  { %v2950_v36 = vpack.c.bf16 %v2060_v34, %v2059_v58  ;;  %v2908_v37 = vpop.f32.mrb[84].mxu1 }
 0x3a0   :  { %v1877_v38 = vadd.f32 %v2908_v37, %v3665_v29  ;;  %v1868_v39 = vpop.f32.mrb[85].mxu1 }
 0x3a1   :  { %v1869_v40 = vadd.f32 %v3665_v29, %v1868_v39  ;;  %v2909_v44 = vpop.f32.mrb[86].mxu1  ;;  %2951 = vmatprep.subr.bf16.mxu0 %v2950_v36 }
 0x3a2   :  { %v1880_v45 = vadd.f32 %v2909_v44, %v3665_v29  ;;  %v1871_v46 = vpop.f32.mrb[87].mxu1  ;;  %2953 = vmatpush3.bf16.xpose.msra.mxu0 %v3673_v43  ;;  %v2065_v50 = vmax.f32 %v1877_v38, 0.0 }
 0x3a3   :  { %v1872_v49 = vadd.f32 %v3665_v29, %v1871_v46  ;;  %2955 = vmatprep.subr.bf16.mxu0 %v2954_v35  ;;  %v2063_v52 = vmax.f32 %v1869_v40, 0.0 }
 0x3a4   :  { %v2066_v51 = vmax.f32 %v1880_v45, 0.0 }
 0x3a5   :  { %v2064_v53 = vmax.f32 %v1872_v49, 0.0 }
 0x3a6   :  { %v2962_v54 = vpack.c.bf16 %v2066_v51, %v2065_v50 }
 0x3a7   :  { %v2958_v55 = vpack.c.bf16 %v2064_v53, %v2063_v52  ;;  %v2912_v59 = vpop.f32.mrb[88].mxu1 }
 0x3a8   :  { %v1893_v60 = vadd.f32 %v2912_v59, %v3665_v29  ;;  %v1884_v43 = vpop.f32.mrb[89].mxu1 }
 0x3a9   :  { %v1885_v61 = vadd.f32 %v3665_v29, %v1884_v43  ;;  %v2913_v62 = vpop.f32.mrb[90].mxu1 }
 0x3aa   :  { %v1896_v18 = vadd.f32 %v2913_v62, %v3665_v29  ;;  %v1887_v63 = vpop.f32.mrb[91].mxu1  ;;  %2957 = vmatpush3.bf16.xpose.msra.mxu0 %v3671_v41  ;;  %v2069_v2 = vmax.f32 %v1893_v60, 0.0 }
 0x3ab   :  { %v1888_v1 = vadd.f32 %v3665_v29, %v1887_v63  ;;  %2959 = vmatprep.subr.bf16.mxu0 %v2958_v55  ;;  %v2067_v4 = vmax.f32 %v1885_v61, 0.0 }
 0x3ac   :  { %v2070_v3 = vmax.f32 %v1896_v18, 0.0 }
 0x3ad   :  { %v2068_v5 = vmax.f32 %v1888_v1, 0.0 }
 0x3ae   :  { %v2970_v8 = vpack.c.bf16 %v2070_v3, %v2069_v2 }
 0x3af   :  { %v2966_v9 = vpack.c.bf16 %v2068_v5, %v2067_v4  ;;  %v2916_v10 = vpop.f32.mrb[92].mxu1 }
 0x3b0   :  { %v1909_v11 = vadd.f32 %v2916_v10, %v3665_v29  ;;  %v1900_v12 = vpop.f32.mrb[93].mxu1 }
 0x3b1   :  { %v1901_v13 = vadd.f32 %v3665_v29, %v1900_v12  ;;  %v2917_v14 = vpop.f32.mrb[94].mxu1 }
 0x3b2   :  { %v1912_v41 = vadd.f32 %v2917_v14, %v3665_v29  ;;  %v1903_v15 = vpop.f32.mrb[95].mxu1  ;;  %2961 = vmatpush3.bf16.xpose.msra.mxu0 %v3681_v57  ;;  %v2073_v17 = vmax.f32 %v1909_v11, 0.0 }
 0x3b3   :  { %v1904_v16 = vadd.f32 %v3665_v29, %v1903_v15  ;;  %2963 = vmatprep.subr.bf16.mxu0 %v2962_v54  ;;  %v2071_v20 = vmax.f32 %v1901_v13, 0.0 }
 0x3b4   :  { %v2074_v19 = vmax.f32 %v1912_v41, 0.0 }
 0x3b5   :  { %v2072_v23 = vmax.f32 %v1904_v16, 0.0 }
 0x3b6   :  { %v2978_v42 = vpack.c.bf16 %v2074_v19, %v2073_v17 }
 0x3b7   :  { %v2974_v24 = vpack.c.bf16 %v2072_v23, %v2071_v20  ;;  %v2920_v25 = vpop.f32.mrb[96].mxu1 }
 0x3b8   :  { %v1925_v26 = vadd.f32 %v2920_v25, %v3665_v29  ;;  %v1916_v27 = vpop.f32.mrb[97].mxu1 }
 0x3b9   :  { %v1917_v28 = vadd.f32 %v3665_v29, %v1916_v27  ;;  %v2921_v30 = vpop.f32.mrb[98].mxu1 }
 0x3ba   :  { %v1928_v32 = vadd.f32 %v2921_v30, %v3665_v29  ;;  %v1919_v33 = vpop.f32.mrb[99].mxu1  ;;  %2965 = vmatpush3.bf16.xpose.msra.mxu0 %v3679_v56  ;;  %v2077_v58 = vmax.f32 %v1925_v26, 0.0 }
 0x3bb   :  { %v1920_v57 = vadd.f32 %v3665_v29, %v1919_v33  ;;  %2967 = vmatprep.subr.bf16.mxu0 %v2966_v9  ;;  %v2075_v35 = vmax.f32 %v1917_v28, 0.0 }
 0x3bc   :  { %v2078_v34 = vmax.f32 %v1928_v32, 0.0 }
 0x3bd   :  { %v2076_v36 = vmax.f32 %v1920_v57, 0.0 }
 0x3be   :  { %v3733_v37 = vpack.c.bf16 %v2078_v34, %v2077_v58 }
 0x3bf   :  { %v3735_v38 = vpack.c.bf16 %v2076_v36, %v2075_v35  ;;  %v2924_v39 = vpop.f32.mrb[100].mxu1 }
 0x3c0   :  { %v1941_v40 = vadd.f32 %v2924_v39, %v3665_v29  ;;  %v1932_v44 = vpop.f32.mrb[101].mxu1 }
 0x3c1   :  { %v1933_v45 = vadd.f32 %v3665_v29, %v1932_v44  ;;  %v2925_v46 = vpop.f32.mrb[102].mxu1 }
 0x3c2   :  { %v1944_v56 = vadd.f32 %v2925_v46, %v3665_v29  ;;  %v1935_v47 = vpop.f32.mrb[103].mxu1  ;;  %2969 = vmatpush3.bf16.xpose.msra.mxu0 %v3689_v7  ;;  %v2081_v49 = vmax.f32 %v1941_v40, 0.0 }
 0x3c3   :  { %v1936_v48 = vadd.f32 %v3665_v29, %v1935_v47  ;;  %2971 = vmatprep.subr.bf16.mxu0 %v2970_v8  ;;  %v2079_v51 = vmax.f32 %v1933_v45, 0.0 }
 0x3c4   :  { %v2082_v50 = vmax.f32 %v1944_v56, 0.0 }
 0x3c5   :  { %v2080_v52 = vmax.f32 %v1936_v48, 0.0 }
 0x3c6   :  { %v3742_v53 = vpack.c.bf16 %v2082_v50, %v2081_v49 }
 0x3c7   :  { %v3744_v54 = vpack.c.bf16 %v2080_v52, %v2079_v51  ;;  %v2928_v55 = vpop.f32.mrb[104].mxu1 }
 0x3c8   :  { %v1957_v59 = vadd.f32 %v2928_v55, %v3665_v29  ;;  %v1948_v60 = vpop.f32.mrb[105].mxu1 }
 0x3c9   :  { %v1949_v43 = vadd.f32 %v3665_v29, %v1948_v60  ;;  %v2929_v61 = vpop.f32.mrb[106].mxu1 }
 0x3ca   :  { %v1960_v7 = vadd.f32 %v2929_v61, %v3665_v29  ;;  %v1951_v62 = vpop.f32.mrb[107].mxu1  ;;  %2973 = vmatpush3.bf16.xpose.msra.mxu0 %v3687_v6  ;;  %v2085_v63 = vmax.f32 %v1957_v59, 0.0 }
 0x3cb   :  { %v1952_v18 = vadd.f32 %v3665_v29, %v1951_v62  ;;  %2975 = vmatprep.subr.bf16.mxu0 %v2974_v24  ;;  %v2083_v1 = vmax.f32 %v1949_v43, 0.0 }
 0x3cc   :  { %v2086_v0 = vmax.f32 %v1960_v7, 0.0 }
 0x3cd   :  { %v2084_v2 = vmax.f32 %v1952_v18, 0.0 }
 0x3ce   :  { %v3751_v3 = vpack.c.bf16 %v2086_v0, %v2085_v63 }
 0x3cf   :  { %v3753_v4 = vpack.c.bf16 %v2084_v2, %v2083_v1  ;;  %v2932_v5 = vpop.f32.mrb[108].mxu1 }
 0x3d0   :  { %v1973_v8 = vadd.f32 %v2932_v5, %v3665_v29  ;;  %v1964_v9 = vpop.f32.mrb[109].mxu1 }
 0x3d1   :  { %v1965_v10 = vadd.f32 %v3665_v29, %v1964_v9  ;;  %v2933_v11 = vpop.f32.mrb[110].mxu1 }
 0x3d2   :  { %v1976_v6 = vadd.f32 %v2933_v11, %v3665_v29  ;;  %v1967_v12 = vpop.f32.mrb[111].mxu1  ;;  %2977 = vmatpush3.bf16.xpose.msra.mxu0 %v3697_v22  ;;  %v2089_v14 = vmax.f32 %v1973_v8, 0.0 }
 0x3d3   :  { %v1968_v13 = vadd.f32 %v3665_v29, %v1967_v12  ;;  %2979 = vmatprep.subr.bf16.mxu0 %v2978_v42  ;;  %v2087_v15 = vmax.f32 %v1965_v10, 0.0 }
 0x3d4   :  { %v2090_v41 = vmax.f32 %v1976_v6, 0.0 }
 0x3d5   :  { %v2088_v16 = vmax.f32 %v1968_v13, 0.0 }
 0x3d6   :  { %v3760_v17 = vpack.c.bf16 %v2090_v41, %v2089_v14 }
 0x3d7   :  { %v3762_v19 = vpack.c.bf16 %v2088_v16, %v2087_v15  ;;  %v2936_v20 = vpop.f32.mrb[112].mxu1 }
 0x3d8   :  { %v1989_v23 = vadd.f32 %v2936_v20, %v3665_v29  ;;  %v1980_v24 = vpop.f32.mrb[113].mxu1 }
 0x3d9   :  { %v1981_v25 = vadd.f32 %v3665_v29, %v1980_v24  ;;  %v2937_v26 = vpop.f32.mrb[114].mxu1 }
 0x3da   :  { %v1992_v22 = vadd.f32 %v2937_v26, %v3665_v29  ;;  %v1983_v27 = vpop.f32.mrb[115].mxu1  ;;  %2981 = vmatpush3.bf16.xpose.msra.mxu0 %v3695_v21  ;;  %v2093_v28 = vmax.f32 %v1989_v23, 0.0 }
 0x3db   :  { %v1984_v42 = vadd.f32 %v3665_v29, %v1983_v27  ;;  %v2091_v32 = vmax.f32 %v1981_v25, 0.0 }
 0x3dc   :  { %v2094_v30 = vmax.f32 %v1992_v22, 0.0 }
 0x3dd   :  { %v2092_v33 = vmax.f32 %v1984_v42, 0.0 }
 0x3de   :  { %v2986_v57 = vpack.c.bf16 %v2094_v30, %v2093_v28 }
 0x3df   :  { %v2982_v58 = vpack.c.bf16 %v2092_v33, %v2091_v32  ;;  %v2940_v34 = vpop.f32.mrb[116].mxu1 }
 0x3e0   :  { %v2005_v35 = vadd.f32 %v2940_v34, %v3665_v29  ;;  %v1996_v36 = vpop.f32.mrb[117].mxu1 }
 0x3e1   :  { %2983 = vmatprep.subr.bf16.mxu1 %v2982_v58  ;;  %v1997_v39 = vadd.f32 %v3665_v29, %v1996_v36  ;;  %v2941_v40 = vpop.f32.mrb[118].mxu1  ;;  %2623 = vmatmul.mubr.f32.vlgmr.msra.gmra.mrb[128].mxu0 %v3706_v31 }
 0x3e2   :  { %2985 = vmatpush3.bf16.xpose.msra.mxu1 %v3735_v38  ;;  %v2008_v21 = vadd.f32 %v2941_v40, %v3665_v29  ;;  %v1999_v44 = vpop.f32.mrb[119].mxu1  ;;  %v2097_v46 = vmax.f32 %v2005_v35, 0.0 }
 0x3e3   :  { %2987 = vmatprep.subr.bf16.mxu1 %v2986_v57  ;;  %v2000_v45 = vadd.f32 %v3665_v29, %v1999_v44  ;;  %v2095_v47 = vmax.f32 %v1997_v39, 0.0 }
 0x3e4   :  { %v2098_v56 = vmax.f32 %v2008_v21, 0.0 }
 0x3e5   :  { %v2096_v48 = vmax.f32 %v2000_v45, 0.0 }
 0x3e6   :  { %v2994_v49 = vpack.c.bf16 %v2098_v56, %v2097_v46 }
 0x3e7   :  { %v2990_v50 = vpack.c.bf16 %v2096_v48, %v2095_v47  ;;  %v2944_v51 = vpop.f32.mrb[120].mxu1  ;;  %v3052_v47 = vmov 1966171168  }
 0x3e8   :  { %v2021_v52 = vadd.f32 %v2944_v51, %v3665_v29  ;;  %v2012_v55 = vpop.f32.mrb[121].mxu1  ;;  %v2295_v48 = vunpack.c.l.s4 %v3052_v47 }
 0x3e9   :  { %v2013_v59 = vadd.f32 %v3665_v29, %v2012_v55  ;;  %v2945_v60 = vpop.f32.mrb[122].mxu1 }
 0x3ea   :  { %2989 = vmatpush3.bf16.xpose.msra.mxu1 %v3733_v37  ;;  %v2101_v38 = vmax.f32 %v2021_v52, 0.0  ;;  %v2024_v43 = vadd.f32 %v2945_v60, %v3665_v29  ;;  %v2015_v61 = vpop.f32.mrb[123].mxu1 }
 0x3eb   :  { %2991 = vmatprep.subr.bf16.mxu1 %v2990_v50  ;;  %v2099_v7 = vmax.f32 %v2013_v59, 0.0  ;;  %v2016_v62 = vadd.f32 %v3665_v29, %v2015_v61 }
 0x3ec   :  { %v2102_v18 = vmax.f32 %v2024_v43, 0.0 }
 0x3ed   :  { %v2100_v63 = vmax.f32 %v2016_v62, 0.0 }
 0x3ee   :  { %v3002_v0 = vpack.c.bf16 %v2102_v18, %v2101_v38 }
 0x3ef   :  { %v2998_v1 = vpack.c.bf16 %v2100_v63, %v2099_v7  ;;  %v2948_v2 = vpop.f32.mrb[124].mxu1 }
 0x3f0   :  { %v2037_v5 = vadd.f32 %v2948_v2, %v3665_v29  ;;  %v2028_v8 = vpop.f32.mrb[125].mxu1 }
 0x3f1   :  { %v2029_v9 = vadd.f32 %v3665_v29, %v2028_v8  ;;  %v2949_v10 = vpop.f32.mrb[126].mxu1 }
 0x3f2   :  { %2993 = vmatpush3.bf16.xpose.msra.mxu1 %v3744_v54  ;;  %v2105_v37 = vmax.f32 %v2037_v5, 0.0  ;;  %v2040_v11 = vadd.f32 %v2949_v10, %v3665_v29  ;;  %v2031_v6 = vpop.f32.mrb[127].mxu1 }
 0x3f3   :  { %2995 = vmatprep.subr.bf16.mxu1 %v2994_v49  ;;  %v2103_v12 = vmax.f32 %v2029_v9, 0.0  ;;  %v2032_v13 = vadd.f32 %v3665_v29, %v2031_v6  ;;  %v2256_v29 = vlaneseq  ;;  %v2296_v49 = vunpack.c.0.s8 %v2295_v48 }
 0x3f4   :  { %v2106_v14 = vmax.f32 %v2040_v11, 0.0 }
 0x3f5   :  { %v2104_v41 = vmax.f32 %v2032_v13, 0.0  ;;  %v2257_v54 = vshrl.u32 %v2256_v29, 7  ;;  %vm2319_vm2 = vcmp.lt.s32.totalorder %v2256_v29, 512 }
 0x3f6   :  { %v3010_v15 = vpack.c.bf16 %v2106_v14, %v2105_v37 }
 0x3f7   :  { %v3006_v16 = vpack.c.bf16 %v2104_v41, %v2103_v12  ;;  %v2258_v20 = vsub.s32 0, %v2257_v54  ;;  %v2299_v50 = vsub.s32 %v2296_v49, %v2257_v54 }
 0x3fa   :  { %2997 = vmatpush3.bf16.xpose.msra.mxu1 %v3742_v53 }
 0x3fb   :  { %2999 = vmatprep.subr.bf16.mxu1 %v2998_v1 }
 0x402   :  { %3001 = vmatpush3.bf16.xpose.msra.mxu1 %v3753_v4 }
 0x403   :  { %3003 = vmatprep.subr.bf16.mxu1 %v3002_v0 }
 0x40a   :  { %3005 = vmatpush3.bf16.xpose.msra.mxu1 %v3751_v3 }
 0x40b   :  { %3007 = vmatprep.subr.bf16.mxu1 %v3006_v16  ;;  %v2254_v23 = vpop.permute.xlu0 %2253 }
 0x40c   :  { %v2259_v24 = vrot.slane %v2254_v23, %v2258_v20 }
 0x412   :  { %3009 = vmatpush3.bf16.xpose.msra.mxu1 %v3762_v19 }
 0x413   :  { %3011 = vmatprep.subr.bf16.mxu1 %v3010_v15 }
 0x41a   :  { %3013 = vmatpush3.bf16.xpose.msra.mxu1 %v3760_v17 }
 0x421   :  { %2657 = vmatmul.mubr.f32.vlgmr.msra.gmra.mrb[128].mxu1 %v3706_v31 }
 0x4b4   :  { %v2174_v53 = vpop.f32.mrb[128].mxu0 }
 0x4b5   :  { %v2260_v25 = vadd.f32 %v2259_v24, %v2174_v53  ;;  %v2176_v26 = vpop.f32.mrb[129].mxu0 }
 0x4b6   :  { %v2261_v4 = vadd.f32 %v2259_v24, %v2176_v26 }
 0x4b7   :  { %v2264_v22 = vsub.f32 0.0, %v2260_v25 }
 0x4b8   :  { %v2265_v27 = vsub.f32 0.0, %v2261_v4 }
 0x4b9   :  { %v2268_v3 = vmul.f32 1.442695, %v2264_v22 }
 0x4ba   :  { %v2270_v42 = vmul.f32 1.442695, %v2265_v27 }
 0x4bb   :  { %3035 = vpow2.f32 %v2268_v3 }
 0x4bc   :  { %3037 = vpow2.f32 %v2270_v42 }
 0x4c5   :  { %v3036_v19 = vpop.eup %3035 }
 0x4c6   :  { %v3038_v28 = vpop.eup %3037  ;;  %v2276_v17 = vadd.f32 1.0, %v3036_v19 }
 0x4c7   :  { %v2277_v30 = vadd.f32 1.0, %v3038_v28 }
 0x4c8   :  { %3039 = vrcp.f32 %v2276_v17 }
 0x4c9   :  { %3041 = vrcp.f32 %v2277_v30 }
 0x4d2   :  { %v3040_v31 = vpop.eup %3039 }
 0x4d3   :  { %v3042_v32 = vpop.eup %3041 }
 0x4d4   :  { %v2292_v33 = vcombine.low %v3040_v31, %v3042_v32 }
 0x4d6   :  { %v2300_v55 = vrot.slane %v2292_v33, %v2299_v50 }
 0x4f4   :  { %v2245_v57 = vpop.f32.mrb[128].mxu1 }
 0x4f5   :  { %v2262_v58 = vadd.f32 %v2259_v24, %v2245_v57  ;;  %v2247_v34 = vpop.f32.mrb[129].mxu1 }
 0x4f6   :  { %v2263_v35 = vadd.f32 %v2259_v24, %v2247_v34 }
 0x4f7   :  { %v2266_v36 = vsub.f32 0.0, %v2262_v58 }
 0x4f8   :  { %v2267_v39 = vsub.f32 0.0, %v2263_v35 }
 0x4f9   :  { %v2272_v40 = vmul.f32 1.442695, %v2266_v36 }
 0x4fa   :  { %v2274_v21 = vmul.f32 1.442695, %v2267_v39 }
 0x4fb   :  { %3043 = vpow2.f32 %v2272_v40 }
 0x4fc   :  { %3045 = vpow2.f32 %v2274_v21 }
 0x505   :  { %v3044_v44 = vpop.eup %3043 }
 0x506   :  { %v3046_v45 = vpop.eup %3045  ;;  %v2278_v46 = vadd.f32 1.0, %v3044_v44 }
 0x507   :  { %v2279_v56 = vadd.f32 1.0, %v3046_v45 }
 0x508   :  { %3047 = vrcp.f32 %v2278_v46 }
 0x509   :  { %3049 = vrcp.f32 %v2279_v56 }
 0x512   :  { %v3048_v51 = vpop.eup %3047 }
 0x513   :  { %v3050_v52 = vpop.eup %3049 }
 0x514   :  { %v2293_v59 = vcombine.low %v3048_v51, %v3050_v52 }
 0x516   :  { %v2307_v60 = vrot.slane %v2293_v59, %v2299_v50 }
 0x518   :  { %v2308_v38 = vcombine.low %v2300_v55, %v2307_v60 }
 0x51a   :  { %v2315_v43 = vrot.slane %v2308_v38, %v2299_v50 }
 0x51c   :  { %2321 = vst.msk [vmem:[%s3805_s11] sm:$0xf] %vm2319_vm2, %v2315_v43 }

</bundles_post_ra>
